<compile_context>
chip_gen: v6e
topology: v6e:2x2x1
jax: 0.10.0
libtpu: 0.0.40
codegen_flags: <defaults>
</compile_context>

<pallas_src>
import jax
import jax.numpy as jnp
from jax import lax
from jax.experimental import pallas as pl
from jax.experimental.pallas import tpu as pltpu

D_IN = 8
D_OUT = 4
D_OUT_PAD = 8                       # lin_out rows zero-padded to a sublane multiple
D_LATENT = 16
D_HIDDEN = 32
N_BLOCKS = 5
D_ZX = D_LATENT + D_IN              # 24
D_ZX_PAD = 32                       # zx features padded; column 24 = 1.0 (bias lane)
N_STAGE = N_BLOCKS * D_HIDDEN       # 160: [lin_in + lin_z[0], lin_z[1], ..., lin_z[4]]
SLAB_ROWS = D_HIDDEN + D_OUT_PAD    # 40: rows 0:32 feat, 32:36 out, 36:40 pad
COMBINE_LAYER = 1000
USE_SPADE = False


def resnetfc_kernel(zx_ref, ws_ref, w0_ref, b0_ref, w1_ref, b1_ref,
                    wo_ref, bo_ref, out_ref):
    bf16, f32 = jnp.bfloat16, jnp.float32

    # Fused input stage (lin_in + all lin_z layers + folded biases) in one matmul.
    # zx_ref is row-major (tile, 32) bf16; contract its feature axis (dim 1) directly
    # ("trans_b" form, same class as q @ k^T) -> feature-major (160, tile) result,
    # so no HBM-side transpose is ever materialized.
    stage = lax.dot_general(ws_ref[...], zx_ref[...],
                            dimension_numbers=(((1,), (1,)), ((), ())),
                            preferred_element_type=f32)        # (160, tile) f32
    stage = stage.astype(bf16)          # halve the resident slab; x stays f32 below

    x = stage[:D_HIDDEN, :].astype(f32)                         # (32, tile) f32
    for blk in range(N_BLOCKS):
        if blk > 0:
            x = x + stage[blk * D_HIDDEN:(blk + 1) * D_HIDDEN, :].astype(f32)
        # ResnetBlockFC (size_in == size_out -> identity shortcut), ReLU activation.
        h0 = jnp.maximum(x, 0.0).astype(bf16)
        net = jnp.dot(w0_ref[blk], h0, preferred_element_type=f32) + b0_ref[blk]
        h1 = jnp.maximum(net, 0.0).astype(bf16)
        x = x + jnp.dot(w1_ref[blk], h1, preferred_element_type=f32) + b1_ref[blk]

    hx = jnp.maximum(x, 0.0).astype(bf16)
    out8 = jnp.dot(wo_ref[...], hx, preferred_element_type=f32) + bo_ref[...]  # (8, tile)
    # One full, lane-dense store of the merged slab (feat | out | pad).
    out_ref[...] = jnp.concatenate([x, out8], axis=0).astype(bf16)


def prepare_kernel_params(params):
    """Kernel-layout weights: feature-major, bf16 operands, stage bias folded."""
    f32, bf16 = jnp.float32, jnp.bfloat16
    w_stage = jnp.zeros((N_STAGE, D_ZX_PAD), f32)
    # Block-0 row group: fused lin_z[0] (cols 0:16) + lin_in (cols 16:24) + bias (col 24).
    w_stage = w_stage.at[:D_HIDDEN, :D_LATENT].set(params["w_z"][0].T)
    w_stage = w_stage.at[:D_HIDDEN, D_LATENT:D_ZX].set(params["w_in"].T)
    w_stage = w_stage.at[:D_HIDDEN, D_ZX].set(params["b_in"] + params["b_z"][0])
    for blk in range(1, N_BLOCKS):
        lo = blk * D_HIDDEN
        w_stage = w_stage.at[lo:lo + D_HIDDEN, :D_LATENT].set(params["w_z"][blk].T)
        w_stage = w_stage.at[lo:lo + D_HIDDEN, D_ZX].set(params["b_z"][blk])
    w_out = jnp.zeros((D_OUT_PAD, D_HIDDEN), f32).at[:D_OUT].set(params["w_out"].T)
    b_out = jnp.zeros((D_OUT_PAD,), f32).at[:D_OUT].set(params["b_out"])
    return {
        "w_stage": w_stage.astype(bf16),                        # (160, 32)
        "w0": params["w0"].transpose(0, 2, 1).astype(bf16),     # (5, 32, 32) (out, in)
        "b0": params["b0"][:, :, None].astype(f32),             # (5, 32, 1)
        "w1": params["w1"].transpose(0, 2, 1).astype(bf16),     # (5, 32, 32)
        "b1": params["b1"][:, :, None].astype(f32),             # (5, 32, 1)
        "w_out": w_out.astype(bf16),                            # (8, 32)
        "b_out": b_out[:, None].astype(f32),                    # (8, 1)
    }


def _round_up(x, m):
    return ((x + m - 1) // m) * m


def resnetfc_forward(zx, params, *, tile_rows=8192):
    """ResnetFC forward. Returns (out, feat) as bf16 arrays in natural (..., C) layout."""
    assert tile_rows % 256 == 0, "tile_rows must be a multiple of 256"
    assert zx.shape[-1] == D_ZX
    # Guard the hard-coded config: combine_interleaved / SPADE paths are not implemented.
    assert COMBINE_LAYER > N_BLOCKS and not USE_SPADE

    orig_lead = zx.shape[:-1]
    kp = prepare_kernel_params(params)

    zx2 = zx.reshape(-1, D_ZX).astype(jnp.bfloat16)
    n_rows = zx2.shape[0]

    # Adaptive tile size: never larger than the (256-aligned) row count, and split into
    # >= 2 grid steps when there is enough work so dimension_semantics=("parallel",)
    # can shard rows across v7x's two TensorCores; then even out the tiles to minimise
    # zero-pad rows. tile stays a multiple of 256 (lane dim of the output blocks).
    rows_al = max(256, _round_up(n_rows, 256))
    tile = min(tile_rows, rows_al)
    n_steps = pl.cdiv(n_rows, tile)
    if n_steps == 1 and rows_al >= 512:
        n_steps = 2
    tile = min(tile_rows, max(256, _round_up(pl.cdiv(n_rows, n_steps), 256)))
    n_steps = pl.cdiv(n_rows, tile)
    n_pad = n_steps * tile

    # Row-major padded input (no transpose): col 24 = 1.0 carries the folded stage bias.
    ones = jnp.ones((n_rows, 1), jnp.bfloat16)
    zpad = jnp.zeros((n_rows, D_ZX_PAD - D_ZX - 1), jnp.bfloat16)
    zxp = jnp.concatenate([zx2, ones, zpad], axis=-1)
    zxp = jnp.pad(zxp, ((0, n_pad - n_rows), (0, 0)))           # (n_pad, 32) bf16

    def const_spec(shape):
        # Constant block index -> the pipeline fetches this block once (revisit elision),
        # not once per grid step.
        nd = len(shape)
        return pl.BlockSpec(shape, lambda i, _nd=nd: (0,) * _nd)

    flops = 2 * n_pad * (N_STAGE * D_ZX_PAD
                         + N_BLOCKS * 2 * D_HIDDEN * D_HIDDEN
                         + D_OUT_PAD * D_HIDDEN)
    weight_bytes = (2 * (N_STAGE * D_ZX_PAD
                         + 2 * N_BLOCKS * D_HIDDEN * D_HIDDEN
                         + D_OUT_PAD * D_HIDDEN)
                    + 4 * (2 * N_BLOCKS * D_HIDDEN + D_OUT_PAD))
    bytes_accessed = n_pad * 2 * (D_ZX_PAD + SLAB_ROWS) + weight_bytes

    slab = pl.pallas_call(
        resnetfc_kernel,
        out_shape=jax.ShapeDtypeStruct((SLAB_ROWS, n_pad), jnp.bfloat16),
        grid_spec=pltpu.PrefetchScalarGridSpec(
            num_scalar_prefetch=0,
            grid=(n_steps,),
            in_specs=[
                pl.BlockSpec((tile, D_ZX_PAD), lambda i: (i, 0)),
                const_spec((N_STAGE, D_ZX_PAD)),
                const_spec((N_BLOCKS, D_HIDDEN, D_HIDDEN)),
                const_spec((N_BLOCKS, D_HIDDEN, 1)),
                const_spec((N_BLOCKS, D_HIDDEN, D_HIDDEN)),
                const_spec((N_BLOCKS, D_HIDDEN, 1)),
                const_spec((D_OUT_PAD, D_HIDDEN)),
                const_spec((D_OUT_PAD, 1)),
            ],
            out_specs=pl.BlockSpec((SLAB_ROWS, tile), lambda i: (0, i)),
        ),
        compiler_params=pltpu.CompilerParams(
            dimension_semantics=("parallel",),
            vmem_limit_bytes=32 * 1024 * 1024),
        cost_estimate=pl.CostEstimate(flops=flops, transcendentals=0,
                                      bytes_accessed=bytes_accessed),
    )(zxp, kp["w_stage"], kp["w0"], kp["b0"], kp["w1"], kp["b1"],
      kp["w_out"], kp["b_out"])

    # Split + re-layout of the bf16 slab (half the HBM bytes of the previous f32 path).
    feat = slab[:D_HIDDEN, :n_rows].T.reshape(orig_lead + (D_HIDDEN,))
    out = slab[D_HIDDEN:D_HIDDEN + D_OUT, :n_rows].T.reshape(orig_lead + (D_OUT,))
    return out, feat


def resnetfc_reference(zx, params):
    """Pure-JAX f32 reference mirroring the PyTorch forward."""
    zx = zx.astype(jnp.float32)
    z = zx[..., :D_LATENT]
    x = zx[..., D_LATENT:] @ params["w_in"] + params["b_in"]
    for blk in range(N_BLOCKS):
        x = x + (z @ params["w_z"][blk] + params["b_z"][blk])
        net = jnp.maximum(x, 0.0) @ params["w0"][blk] + params["b0"][blk]
        dx = jnp.maximum(net, 0.0) @ params["w1"][blk] + params["b1"][blk]
        x = x + dx
    out = jnp.maximum(x, 0.0) @ params["w_out"] + params["b_out"]
    return out, x


def resnetfc_reference_bf16(zx, params):
    """Mirrors the kernel arithmetic: bf16 operands / f32 accumulation, fused bf16
    stage slab (folded bias), f32 residual accumulation, bf16 final outputs."""
    bf16, f32 = jnp.bfloat16, jnp.float32
    dot = lambda a, w: jnp.dot(a.astype(bf16), w.astype(bf16),
                               preferred_element_type=f32)
    rnd = lambda a: a.astype(bf16).astype(f32)
    zx = zx.astype(f32)
    z = zx[..., :D_LATENT]
    xin = zx[..., D_LATENT:]
    stage = []
    b_fused = (params["b_in"] + params["b_z"][0]).astype(bf16).astype(f32)
    stage.append(rnd(dot(z, params["w_z"][0]) + dot(xin, params["w_in"]) + b_fused))
    for blk in range(1, N_BLOCKS):
        bz = params["b_z"][blk].astype(bf16).astype(f32)
        stage.append(rnd(dot(z, params["w_z"][blk]) + bz))
    x = stage[0]
    for blk in range(N_BLOCKS):
        if blk > 0:
            x = x + stage[blk]
        net = dot(jnp.maximum(x, 0.0), params["w0"][blk]) + params["b0"][blk]
        dx = dot(jnp.maximum(net, 0.0), params["w1"][blk]) + params["b1"][blk]
        x = x + dx
    out = dot(jnp.maximum(x, 0.0), params["w_out"]) + params["b_out"]
    return out.astype(bf16), x.astype(bf16)


def init_params(key):
    """Deterministic synthetic parameters in natural (in, out) layout.

    Kaiming-normal (fan_in, gain=sqrt(2)) like the module; biases zero. Note: the
    PyTorch module zero-inits fc_1, but small random weights are used here so the
    residual path is actually exercised by the kernel."""
    ks = jax.random.split(key, 5)

    def kaiming(k, shape, fan_in):
        std = (2.0 / fan_in) ** 0.5
        return std * jax.random.normal(k, shape, jnp.float32)

    return {
        "w_in": kaiming(ks[0], (D_IN, D_HIDDEN), D_IN),
        "b_in": jnp.zeros((D_HIDDEN,), jnp.float32),
        "w_z": kaiming(ks[1], (N_BLOCKS, D_LATENT, D_HIDDEN), D_LATENT),
        "b_z": jnp.zeros((N_BLOCKS, D_HIDDEN), jnp.float32),
        "w0": kaiming(ks[2], (N_BLOCKS, D_HIDDEN, D_HIDDEN), D_HIDDEN),
        "b0": jnp.zeros((N_BLOCKS, D_HIDDEN), jnp.float32),
        "w1": 0.05 * kaiming(ks[3], (N_BLOCKS, D_HIDDEN, D_HIDDEN), D_HIDDEN),
        "b1": jnp.zeros((N_BLOCKS, D_HIDDEN), jnp.float32),
        "w_out": kaiming(ks[4], (D_HIDDEN, D_OUT), D_HIDDEN),
        "b_out": jnp.zeros((D_OUT,), jnp.float32),
    }


if __name__ == "__main__":
    key = jax.random.PRNGKey(0)
    k_p, k_x = jax.random.split(key)
    params = init_params(k_p)

    # zx: (batch=2, rays=64, d_latent + d_in = 24) -> 128 rows (one small tile).
    zx = jax.random.normal(k_x, (2, 64, D_ZX), jnp.float32)

    out, feat = resnetfc_forward(zx, params)
    out, feat = jax.block_until_ready(out), jax.block_until_ready(feat)

    assert out.shape == (2, 64, D_OUT) and feat.shape == (2, 64, D_HIDDEN)

    # Tight check vs a pure-JAX reference that mirrors the kernel's bf16/f32 arithmetic.
    ref_out_bf, ref_feat_bf = resnetfc_reference_bf16(zx, params)
    assert jnp.allclose(out.astype(jnp.float32), ref_out_bf.astype(jnp.float32),
                        atol=2e-2, rtol=2e-2)
    assert jnp.allclose(feat.astype(jnp.float32), ref_feat_bf.astype(jnp.float32),
                        atol=2e-2, rtol=2e-2)

    # Loose sanity check vs the full-f32 reference (bf16 rounding only).
    ref_out, ref_feat = resnetfc_reference(zx, params)
    assert jnp.allclose(out.astype(jnp.float32), ref_out, atol=2.5e-1, rtol=5e-2)
    assert jnp.allclose(feat.astype(jnp.float32), ref_feat, atol=2.5e-1, rtol=5e-2)

    print("KERNEL_OK")
</pallas_src>

<mosaic_0001>
module attributes {stable_mosaic.version = 11 : i64} {
  func.func @resnetfc_kernel(%arg0: i32, %arg1: memref<256x32xbf16, #tpu.memory_space<vmem>>, %arg2: memref<160x32xbf16, #tpu.memory_space<vmem>>, %arg3: memref<5x32x32xbf16, #tpu.memory_space<vmem>>, %arg4: memref<5x32x1xf32, #tpu.memory_space<vmem>>, %arg5: memref<5x32x32xbf16, #tpu.memory_space<vmem>>, %arg6: memref<5x32x1xf32, #tpu.memory_space<vmem>>, %arg7: memref<8x32xbf16, #tpu.memory_space<vmem>>, %arg8: memref<8x1xf32, #tpu.memory_space<vmem>>, %arg9: memref<40x256xbf16, #tpu.memory_space<vmem>>) attributes {dimension_semantics = [#tpu.dimension_semantics<parallel>], iteration_bounds = array<i64: 1>, scalar_prefetch = 0 : i64, scratch_operands = 0 : i64, tpu.core_type = #tpu.core_type<tc>, window_params = [{transform_indices = @transform_0, window_bounds = array<i64: 256, 32>}, {pipeline_mode = #tpu.pipeline_mode<synchronous>, transform_indices = @transform_1, window_bounds = array<i64: 160, 32>}, {pipeline_mode = #tpu.pipeline_mode<synchronous>, transform_indices = @transform_2, window_bounds = array<i64: 5, 32, 32>}, {pipeline_mode = #tpu.pipeline_mode<synchronous>, transform_indices = @transform_3, window_bounds = array<i64: 5, 32, 1>}, {pipeline_mode = #tpu.pipeline_mode<synchronous>, transform_indices = @transform_4, window_bounds = array<i64: 5, 32, 32>}, {pipeline_mode = #tpu.pipeline_mode<synchronous>, transform_indices = @transform_5, window_bounds = array<i64: 5, 32, 1>}, {pipeline_mode = #tpu.pipeline_mode<synchronous>, transform_indices = @transform_6, window_bounds = array<i64: 8, 32>}, {pipeline_mode = #tpu.pipeline_mode<synchronous>, transform_indices = @transform_7, window_bounds = array<i64: 8, 1>}, {transform_indices = @transform_8, window_bounds = array<i64: 40, 256>}]} {
    %c0 = arith.constant 0 : index
    %c0_0 = arith.constant 0 : index
    %0 = vector.load %arg2[%c0, %c0_0] : memref<160x32xbf16, #tpu.memory_space<vmem>>, vector<160x32xbf16>
    %c0_1 = arith.constant 0 : index
    %c0_2 = arith.constant 0 : index
    %1 = vector.load %arg1[%c0_1, %c0_2] : memref<256x32xbf16, #tpu.memory_space<vmem>>, vector<256x32xbf16>
    %cst = arith.constant dense<0.000000e+00> : vector<160x256xf32>
    %2 = tpu.matmul %0, %1, %cst {dimension_numbers = #tpu.dot_dimension_numbers<[1], [1], [0], [0], [0, 0, 1, 0], [], []>} : vector<160x32xbf16>, vector<256x32xbf16>, vector<160x256xf32> -> vector<160x256xf32>
    %3 = arith.truncf %2 : vector<160x256xf32> to vector<160x256xbf16>
    %4 = vector.extract_strided_slice %3 {offsets = [0, 0], sizes = [32, 256], strides = [1, 1]} : vector<160x256xbf16> to vector<32x256xbf16>
    %5 = arith.extf %4 : vector<32x256xbf16> to vector<32x256xf32>
    %cst_3 = arith.constant 0.000000e+00 : f32
    %6 = vector.broadcast %cst_3 : f32 to vector<32x256xf32>
    %7 = arith.maximumf %5, %6 : vector<32x256xf32>
    %8 = arith.truncf %7 : vector<32x256xf32> to vector<32x256xbf16>
    %c0_4 = arith.constant 0 : index
    %c0_5 = arith.constant 0 : index
    %c0_6 = arith.constant 0 : index
    %9 = vector.load %arg3[%c0_4, %c0_5, %c0_6] : memref<5x32x32xbf16, #tpu.memory_space<vmem>>, vector<1x32x32xbf16>
    %10 = vector.shape_cast %9 : vector<1x32x32xbf16> to vector<32x32xbf16>
    %cst_7 = arith.constant dense<0.000000e+00> : vector<32x256xf32>
    %11 = tpu.matmul %10, %8, %cst_7 {dimension_numbers = #tpu.dot_dimension_numbers<[1], [0], [0], [1], [0, 0, 1, 1], [], []>} : vector<32x32xbf16>, vector<32x256xbf16>, vector<32x256xf32> -> vector<32x256xf32>
    %c0_8 = arith.constant 0 : index
    %c0_9 = arith.constant 0 : index
    %c0_10 = arith.constant 0 : index
    %12 = vector.load %arg4[%c0_8, %c0_9, %c0_10] : memref<5x32x1xf32, #tpu.memory_space<vmem>>, vector<1x32x1xf32>
    %13 = vector.shape_cast %12 : vector<1x32x1xf32> to vector<32x1xf32>
    %14 = vector.broadcast %13 : vector<32x1xf32> to vector<32x256xf32>
    %15 = arith.addf %11, %14 : vector<32x256xf32>
    %cst_11 = arith.constant 0.000000e+00 : f32
    %16 = vector.broadcast %cst_11 : f32 to vector<32x256xf32>
    %17 = arith.maximumf %15, %16 : vector<32x256xf32>
    %18 = arith.truncf %17 : vector<32x256xf32> to vector<32x256xbf16>
    %c0_12 = arith.constant 0 : index
    %c0_13 = arith.constant 0 : index
    %c0_14 = arith.constant 0 : index
    %19 = vector.load %arg5[%c0_12, %c0_13, %c0_14] : memref<5x32x32xbf16, #tpu.memory_space<vmem>>, vector<1x32x32xbf16>
    %20 = vector.shape_cast %19 : vector<1x32x32xbf16> to vector<32x32xbf16>
    %cst_15 = arith.constant dense<0.000000e+00> : vector<32x256xf32>
    %21 = tpu.matmul %20, %18, %cst_15 {dimension_numbers = #tpu.dot_dimension_numbers<[1], [0], [0], [1], [0, 0, 1, 1], [], []>} : vector<32x32xbf16>, vector<32x256xbf16>, vector<32x256xf32> -> vector<32x256xf32>
    %22 = arith.addf %5, %21 : vector<32x256xf32>
    %c0_16 = arith.constant 0 : index
    %c0_17 = arith.constant 0 : index
    %c0_18 = arith.constant 0 : index
    %23 = vector.load %arg6[%c0_16, %c0_17, %c0_18] : memref<5x32x1xf32, #tpu.memory_space<vmem>>, vector<1x32x1xf32>
    %24 = vector.shape_cast %23 : vector<1x32x1xf32> to vector<32x1xf32>
    %25 = vector.broadcast %24 : vector<32x1xf32> to vector<32x256xf32>
    %26 = arith.addf %22, %25 : vector<32x256xf32>
    %27 = vector.extract_strided_slice %3 {offsets = [32, 0], sizes = [32, 256], strides = [1, 1]} : vector<160x256xbf16> to vector<32x256xbf16>
    %28 = arith.extf %27 : vector<32x256xbf16> to vector<32x256xf32>
    %29 = arith.addf %26, %28 : vector<32x256xf32>
    %cst_19 = arith.constant 0.000000e+00 : f32
    %30 = vector.broadcast %cst_19 : f32 to vector<32x256xf32>
    %31 = arith.maximumf %29, %30 : vector<32x256xf32>
    %32 = arith.truncf %31 : vector<32x256xf32> to vector<32x256xbf16>
    %c1 = arith.constant 1 : index
    %c0_20 = arith.constant 0 : index
    %c0_21 = arith.constant 0 : index
    %33 = vector.load %arg3[%c1, %c0_20, %c0_21] : memref<5x32x32xbf16, #tpu.memory_space<vmem>>, vector<1x32x32xbf16>
    %34 = vector.shape_cast %33 : vector<1x32x32xbf16> to vector<32x32xbf16>
    %cst_22 = arith.constant dense<0.000000e+00> : vector<32x256xf32>
    %35 = tpu.matmul %34, %32, %cst_22 {dimension_numbers = #tpu.dot_dimension_numbers<[1], [0], [0], [1], [0, 0, 1, 1], [], []>} : vector<32x32xbf16>, vector<32x256xbf16>, vector<32x256xf32> -> vector<32x256xf32>
    %c1_23 = arith.constant 1 : index
    %c0_24 = arith.constant 0 : index
    %c0_25 = arith.constant 0 : index
    %36 = vector.load %arg4[%c1_23, %c0_24, %c0_25] : memref<5x32x1xf32, #tpu.memory_space<vmem>>, vector<1x32x1xf32>
    %37 = vector.shape_cast %36 : vector<1x32x1xf32> to vector<32x1xf32>
    %38 = vector.broadcast %37 : vector<32x1xf32> to vector<32x256xf32>
    %39 = arith.addf %35, %38 : vector<32x256xf32>
    %cst_26 = arith.constant 0.000000e+00 : f32
    %40 = vector.broadcast %cst_26 : f32 to vector<32x256xf32>
    %41 = arith.maximumf %39, %40 : vector<32x256xf32>
    %42 = arith.truncf %41 : vector<32x256xf32> to vector<32x256xbf16>
    %c1_27 = arith.constant 1 : index
    %c0_28 = arith.constant 0 : index
    %c0_29 = arith.constant 0 : index
    %43 = vector.load %arg5[%c1_27, %c0_28, %c0_29] : memref<5x32x32xbf16, #tpu.memory_space<vmem>>, vector<1x32x32xbf16>
    %44 = vector.shape_cast %43 : vector<1x32x32xbf16> to vector<32x32xbf16>
    %cst_30 = arith.constant dense<0.000000e+00> : vector<32x256xf32>
    %45 = tpu.matmul %44, %42, %cst_30 {dimension_numbers = #tpu.dot_dimension_numbers<[1], [0], [0], [1], [0, 0, 1, 1], [], []>} : vector<32x32xbf16>, vector<32x256xbf16>, vector<32x256xf32> -> vector<32x256xf32>
    %46 = arith.addf %29, %45 : vector<32x256xf32>
    %c1_31 = arith.constant 1 : index
    %c0_32 = arith.constant 0 : index
    %c0_33 = arith.constant 0 : index
    %47 = vector.load %arg6[%c1_31, %c0_32, %c0_33] : memref<5x32x1xf32, #tpu.memory_space<vmem>>, vector<1x32x1xf32>
    %48 = vector.shape_cast %47 : vector<1x32x1xf32> to vector<32x1xf32>
    %49 = vector.broadcast %48 : vector<32x1xf32> to vector<32x256xf32>
    %50 = arith.addf %46, %49 : vector<32x256xf32>
    %51 = vector.extract_strided_slice %3 {offsets = [64, 0], sizes = [32, 256], strides = [1, 1]} : vector<160x256xbf16> to vector<32x256xbf16>
    %52 = arith.extf %51 : vector<32x256xbf16> to vector<32x256xf32>
    %53 = arith.addf %50, %52 : vector<32x256xf32>
    %cst_34 = arith.constant 0.000000e+00 : f32
    %54 = vector.broadcast %cst_34 : f32 to vector<32x256xf32>
    %55 = arith.maximumf %53, %54 : vector<32x256xf32>
    %56 = arith.truncf %55 : vector<32x256xf32> to vector<32x256xbf16>
    %c2 = arith.constant 2 : index
    %c0_35 = arith.constant 0 : index
    %c0_36 = arith.constant 0 : index
    %57 = vector.load %arg3[%c2, %c0_35, %c0_36] : memref<5x32x32xbf16, #tpu.memory_space<vmem>>, vector<1x32x32xbf16>
    %58 = vector.shape_cast %57 : vector<1x32x32xbf16> to vector<32x32xbf16>
    %cst_37 = arith.constant dense<0.000000e+00> : vector<32x256xf32>
    %59 = tpu.matmul %58, %56, %cst_37 {dimension_numbers = #tpu.dot_dimension_numbers<[1], [0], [0], [1], [0, 0, 1, 1], [], []>} : vector<32x32xbf16>, vector<32x256xbf16>, vector<32x256xf32> -> vector<32x256xf32>
    %c2_38 = arith.constant 2 : index
    %c0_39 = arith.constant 0 : index
    %c0_40 = arith.constant 0 : index
    %60 = vector.load %arg4[%c2_38, %c0_39, %c0_40] : memref<5x32x1xf32, #tpu.memory_space<vmem>>, vector<1x32x1xf32>
    %61 = vector.shape_cast %60 : vector<1x32x1xf32> to vector<32x1xf32>
    %62 = vector.broadcast %61 : vector<32x1xf32> to vector<32x256xf32>
    %63 = arith.addf %59, %62 : vector<32x256xf32>
    %cst_41 = arith.constant 0.000000e+00 : f32
    %64 = vector.broadcast %cst_41 : f32 to vector<32x256xf32>
    %65 = arith.maximumf %63, %64 : vector<32x256xf32>
    %66 = arith.truncf %65 : vector<32x256xf32> to vector<32x256xbf16>
    %c2_42 = arith.constant 2 : index
    %c0_43 = arith.constant 0 : index
    %c0_44 = arith.constant 0 : index
    %67 = vector.load %arg5[%c2_42, %c0_43, %c0_44] : memref<5x32x32xbf16, #tpu.memory_space<vmem>>, vector<1x32x32xbf16>
    %68 = vector.shape_cast %67 : vector<1x32x32xbf16> to vector<32x32xbf16>
    %cst_45 = arith.constant dense<0.000000e+00> : vector<32x256xf32>
    %69 = tpu.matmul %68, %66, %cst_45 {dimension_numbers = #tpu.dot_dimension_numbers<[1], [0], [0], [1], [0, 0, 1, 1], [], []>} : vector<32x32xbf16>, vector<32x256xbf16>, vector<32x256xf32> -> vector<32x256xf32>
    %70 = arith.addf %53, %69 : vector<32x256xf32>
    %c2_46 = arith.constant 2 : index
    %c0_47 = arith.constant 0 : index
    %c0_48 = arith.constant 0 : index
    %71 = vector.load %arg6[%c2_46, %c0_47, %c0_48] : memref<5x32x1xf32, #tpu.memory_space<vmem>>, vector<1x32x1xf32>
    %72 = vector.shape_cast %71 : vector<1x32x1xf32> to vector<32x1xf32>
    %73 = vector.broadcast %72 : vector<32x1xf32> to vector<32x256xf32>
    %74 = arith.addf %70, %73 : vector<32x256xf32>
    %75 = vector.extract_strided_slice %3 {offsets = [96, 0], sizes = [32, 256], strides = [1, 1]} : vector<160x256xbf16> to vector<32x256xbf16>
    %76 = arith.extf %75 : vector<32x256xbf16> to vector<32x256xf32>
    %77 = arith.addf %74, %76 : vector<32x256xf32>
    %cst_49 = arith.constant 0.000000e+00 : f32
    %78 = vector.broadcast %cst_49 : f32 to vector<32x256xf32>
    %79 = arith.maximumf %77, %78 : vector<32x256xf32>
    %80 = arith.truncf %79 : vector<32x256xf32> to vector<32x256xbf16>
    %c3 = arith.constant 3 : index
    %c0_50 = arith.constant 0 : index
    %c0_51 = arith.constant 0 : index
    %81 = vector.load %arg3[%c3, %c0_50, %c0_51] : memref<5x32x32xbf16, #tpu.memory_space<vmem>>, vector<1x32x32xbf16>
    %82 = vector.shape_cast %81 : vector<1x32x32xbf16> to vector<32x32xbf16>
    %cst_52 = arith.constant dense<0.000000e+00> : vector<32x256xf32>
    %83 = tpu.matmul %82, %80, %cst_52 {dimension_numbers = #tpu.dot_dimension_numbers<[1], [0], [0], [1], [0, 0, 1, 1], [], []>} : vector<32x32xbf16>, vector<32x256xbf16>, vector<32x256xf32> -> vector<32x256xf32>
    %c3_53 = arith.constant 3 : index
    %c0_54 = arith.constant 0 : index
    %c0_55 = arith.constant 0 : index
    %84 = vector.load %arg4[%c3_53, %c0_54, %c0_55] : memref<5x32x1xf32, #tpu.memory_space<vmem>>, vector<1x32x1xf32>
    %85 = vector.shape_cast %84 : vector<1x32x1xf32> to vector<32x1xf32>
    %86 = vector.broadcast %85 : vector<32x1xf32> to vector<32x256xf32>
    %87 = arith.addf %83, %86 : vector<32x256xf32>
    %cst_56 = arith.constant 0.000000e+00 : f32
    %88 = vector.broadcast %cst_56 : f32 to vector<32x256xf32>
    %89 = arith.maximumf %87, %88 : vector<32x256xf32>
    %90 = arith.truncf %89 : vector<32x256xf32> to vector<32x256xbf16>
    %c3_57 = arith.constant 3 : index
    %c0_58 = arith.constant 0 : index
    %c0_59 = arith.constant 0 : index
    %91 = vector.load %arg5[%c3_57, %c0_58, %c0_59] : memref<5x32x32xbf16, #tpu.memory_space<vmem>>, vector<1x32x32xbf16>
    %92 = vector.shape_cast %91 : vector<1x32x32xbf16> to vector<32x32xbf16>
    %cst_60 = arith.constant dense<0.000000e+00> : vector<32x256xf32>
    %93 = tpu.matmul %92, %90, %cst_60 {dimension_numbers = #tpu.dot_dimension_numbers<[1], [0], [0], [1], [0, 0, 1, 1], [], []>} : vector<32x32xbf16>, vector<32x256xbf16>, vector<32x256xf32> -> vector<32x256xf32>
    %94 = arith.addf %77, %93 : vector<32x256xf32>
    %c3_61 = arith.constant 3 : index
    %c0_62 = arith.constant 0 : index
    %c0_63 = arith.constant 0 : index
    %95 = vector.load %arg6[%c3_61, %c0_62, %c0_63] : memref<5x32x1xf32, #tpu.memory_space<vmem>>, vector<1x32x1xf32>
    %96 = vector.shape_cast %95 : vector<1x32x1xf32> to vector<32x1xf32>
    %97 = vector.broadcast %96 : vector<32x1xf32> to vector<32x256xf32>
    %98 = arith.addf %94, %97 : vector<32x256xf32>
    %99 = vector.extract_strided_slice %3 {offsets = [128, 0], sizes = [32, 256], strides = [1, 1]} : vector<160x256xbf16> to vector<32x256xbf16>
    %100 = arith.extf %99 : vector<32x256xbf16> to vector<32x256xf32>
    %101 = arith.addf %98, %100 : vector<32x256xf32>
    %cst_64 = arith.constant 0.000000e+00 : f32
    %102 = vector.broadcast %cst_64 : f32 to vector<32x256xf32>
    %103 = arith.maximumf %101, %102 : vector<32x256xf32>
    %104 = arith.truncf %103 : vector<32x256xf32> to vector<32x256xbf16>
    %c4 = arith.constant 4 : index
    %c0_65 = arith.constant 0 : index
    %c0_66 = arith.constant 0 : index
    %105 = vector.load %arg3[%c4, %c0_65, %c0_66] : memref<5x32x32xbf16, #tpu.memory_space<vmem>>, vector<1x32x32xbf16>
    %106 = vector.shape_cast %105 : vector<1x32x32xbf16> to vector<32x32xbf16>
    %cst_67 = arith.constant dense<0.000000e+00> : vector<32x256xf32>
    %107 = tpu.matmul %106, %104, %cst_67 {dimension_numbers = #tpu.dot_dimension_numbers<[1], [0], [0], [1], [0, 0, 1, 1], [], []>} : vector<32x32xbf16>, vector<32x256xbf16>, vector<32x256xf32> -> vector<32x256xf32>
    %c4_68 = arith.constant 4 : index
    %c0_69 = arith.constant 0 : index
    %c0_70 = arith.constant 0 : index
    %108 = vector.load %arg4[%c4_68, %c0_69, %c0_70] : memref<5x32x1xf32, #tpu.memory_space<vmem>>, vector<1x32x1xf32>
    %109 = vector.shape_cast %108 : vector<1x32x1xf32> to vector<32x1xf32>
    %110 = vector.broadcast %109 : vector<32x1xf32> to vector<32x256xf32>
    %111 = arith.addf %107, %110 : vector<32x256xf32>
    %cst_71 = arith.constant 0.000000e+00 : f32
    %112 = vector.broadcast %cst_71 : f32 to vector<32x256xf32>
    %113 = arith.maximumf %111, %112 : vector<32x256xf32>
    %114 = arith.truncf %113 : vector<32x256xf32> to vector<32x256xbf16>
    %c4_72 = arith.constant 4 : index
    %c0_73 = arith.constant 0 : index
    %c0_74 = arith.constant 0 : index
    %115 = vector.load %arg5[%c4_72, %c0_73, %c0_74] : memref<5x32x32xbf16, #tpu.memory_space<vmem>>, vector<1x32x32xbf16>
    %116 = vector.shape_cast %115 : vector<1x32x32xbf16> to vector<32x32xbf16>
    %cst_75 = arith.constant dense<0.000000e+00> : vector<32x256xf32>
    %117 = tpu.matmul %116, %114, %cst_75 {dimension_numbers = #tpu.dot_dimension_numbers<[1], [0], [0], [1], [0, 0, 1, 1], [], []>} : vector<32x32xbf16>, vector<32x256xbf16>, vector<32x256xf32> -> vector<32x256xf32>
    %118 = arith.addf %101, %117 : vector<32x256xf32>
    %c4_76 = arith.constant 4 : index
    %c0_77 = arith.constant 0 : index
    %c0_78 = arith.constant 0 : index
    %119 = vector.load %arg6[%c4_76, %c0_77, %c0_78] : memref<5x32x1xf32, #tpu.memory_space<vmem>>, vector<1x32x1xf32>
    %120 = vector.shape_cast %119 : vector<1x32x1xf32> to vector<32x1xf32>
    %121 = vector.broadcast %120 : vector<32x1xf32> to vector<32x256xf32>
    %122 = arith.addf %118, %121 : vector<32x256xf32>
    %cst_79 = arith.constant 0.000000e+00 : f32
    %123 = vector.broadcast %cst_79 : f32 to vector<32x256xf32>
    %124 = arith.maximumf %122, %123 : vector<32x256xf32>
    %125 = arith.truncf %124 : vector<32x256xf32> to vector<32x256xbf16>
    %c0_80 = arith.constant 0 : index
    %c0_81 = arith.constant 0 : index
    %126 = vector.load %arg7[%c0_80, %c0_81] : memref<8x32xbf16, #tpu.memory_space<vmem>>, vector<8x32xbf16>
    %cst_82 = arith.constant dense<0.000000e+00> : vector<8x256xf32>
    %127 = tpu.matmul %126, %125, %cst_82 {dimension_numbers = #tpu.dot_dimension_numbers<[1], [0], [0], [1], [0, 0, 1, 1], [], []>} : vector<8x32xbf16>, vector<32x256xbf16>, vector<8x256xf32> -> vector<8x256xf32>
    %c0_83 = arith.constant 0 : index
    %c0_84 = arith.constant 0 : index
    %128 = vector.load %arg8[%c0_83, %c0_84] : memref<8x1xf32, #tpu.memory_space<vmem>>, vector<8x1xf32>
    %129 = vector.broadcast %128 : vector<8x1xf32> to vector<8x256xf32>
    %130 = arith.addf %127, %129 : vector<8x256xf32>
    %131 = tpu.concatenate %122, %130 in 0 : vector<32x256xf32>, vector<8x256xf32> -> vector<40x256xf32>
    %132 = arith.truncf %131 : vector<40x256xf32> to vector<40x256xbf16>
    %c0_85 = arith.constant 0 : index
    %c0_86 = arith.constant 0 : index
    %133 = vector.load %arg9[%c0_85, %c0_86] : memref<40x256xbf16, #tpu.memory_space<vmem>>, vector<40x256xbf16>
    tpu.vector_store %arg9[%c0_85, %c0_86], %132 {strides = array<i32>} : memref<40x256xbf16, #tpu.memory_space<vmem>>, vector<40x256xbf16>,
    return
  }
  func.func @transform_0(%arg0: i32) -> (i32, i32) {
    %c0_i32 = arith.constant 0 : i32
    %c0_i32_0 = arith.constant 0 : i32
    return %arg0, %c0_i32 : i32, i32
  }
  func.func @transform_1(%arg0: i32) -> (i32, i32) {
    %c0_i32 = arith.constant 0 : i32
    %c0_i32_0 = arith.constant 0 : i32
    %c0_i32_1 = arith.constant 0 : i32
    return %c0_i32, %c0_i32_0 : i32, i32
  }
  func.func @transform_2(%arg0: i32) -> (i32, i32, i32) {
    %c0_i32 = arith.constant 0 : i32
    %c0_i32_0 = arith.constant 0 : i32
    %c0_i32_1 = arith.constant 0 : i32
    %c0_i32_2 = arith.constant 0 : i32
    return %c0_i32, %c0_i32_0, %c0_i32_1 : i32, i32, i32
  }
  func.func @transform_3(%arg0: i32) -> (i32, i32, i32) {
    %c0_i32 = arith.constant 0 : i32
    %c0_i32_0 = arith.constant 0 : i32
    %c0_i32_1 = arith.constant 0 : i32
    %c0_i32_2 = arith.constant 0 : i32
    return %c0_i32, %c0_i32_0, %c0_i32_1 : i32, i32, i32
  }
  func.func @transform_4(%arg0: i32) -> (i32, i32, i32) {
    %c0_i32 = arith.constant 0 : i32
    %c0_i32_0 = arith.constant 0 : i32
    %c0_i32_1 = arith.constant 0 : i32
    %c0_i32_2 = arith.constant 0 : i32
    return %c0_i32, %c0_i32_0, %c0_i32_1 : i32, i32, i32
  }
  func.func @transform_5(%arg0: i32) -> (i32, i32, i32) {
    %c0_i32 = arith.constant 0 : i32
    %c0_i32_0 = arith.constant 0 : i32
    %c0_i32_1 = arith.constant 0 : i32
    %c0_i32_2 = arith.constant 0 : i32
    return %c0_i32, %c0_i32_0, %c0_i32_1 : i32, i32, i32
  }
  func.func @transform_6(%arg0: i32) -> (i32, i32) {
    %c0_i32 = arith.constant 0 : i32
    %c0_i32_0 = arith.constant 0 : i32
    %c0_i32_1 = arith.constant 0 : i32
    return %c0_i32, %c0_i32_0 : i32, i32
  }
  func.func @transform_7(%arg0: i32) -> (i32, i32) {
    %c0_i32 = arith.constant 0 : i32
    %c0_i32_0 = arith.constant 0 : i32
    %c0_i32_1 = arith.constant 0 : i32
    return %c0_i32, %c0_i32_0 : i32, i32
  }
  func.func @transform_8(%arg0: i32) -> (i32, i32) {
    %c0_i32 = arith.constant 0 : i32
    %c0_i32_0 = arith.constant 0 : i32
    return %c0_i32, %arg0 : i32, i32
  }
}

</mosaic_0001>

<bundles_post_ra>
// kernel: tpu_custom_call.1
= control target key start
LH: loop header
LB: loop body
LE: loop exit
PB: predicated region body
PF: predicated region fallthrough
CT: control target
= control target key end

     0   :  { %vm213_vm0 = vcmask 261120   ;;  %s2656_s0 = inlined_call_operand.vmem [shape: bf16[256,32], index: 0, kind: input, shape index: {}]   ;;  %s2657_s1 = inlined_call_operand.vmem [shape: bf16[160,32], index: 1, kind: input, shape index: {}]   ;;  %s2658_s2 = inlined_call_operand.vmem [shape: bf16[5,32,32], index: 2, kind: input, shape index: {}]   ;;  %s2659_s3 = inlined_call_operand.vmem [shape: f32[5,32,1], index: 3, kind: input, shape index: {}]   ;;  %s2660_s4 = inlined_call_operand.vmem [shape: bf16[5,32,32], index: 4, kind: input, shape index: {}]   ;;  %s2661_s5 = inlined_call_operand.vmem [shape: f32[5,32,1], index: 5, kind: input, shape index: {}]   ;;  %s2662_s6 = inlined_call_operand.vmem [shape: bf16[8,32], index: 6, kind: input, shape index: {}]   ;;  %s2663_s7 = inlined_call_operand.vmem [shape: f32[8,1], index: 7, kind: input, shape index: {}]   ;;  %s2664_s8 = inlined_call_operand.hbm [shape: bf16[40,256], index: 8, kind: output, shape index: {}]  }
   0x1   :  { %v2020_v0 = vld [vmem:[%s2656_s0 + $0x78] sm:$0xff]   ;;  %v2022_v2 = vld [vmem:[%s2656_s0 + $0x70] sm:$0xff]   ;;  %v2024_v6 = vld [vmem:[%s2656_s0 + $0x68] sm:$0xff]  }
   0x2   :  { %v2021_v1 = vld [vmem:[%s2656_s0 + $0x38] sm:$0xff]   ;;  %2006 = vmatprep.subr.msk.bf16.mxu0 %vm213_vm0, %v2020_v0  ;;  %v2023_v4 = vld [vmem:[%s2656_s0 + $0x30] sm:$0xff]   ;;  %v2025_v7 = vld [vmem:[%s2656_s0 + $0x28] sm:$0xff]  }
   0x3   :  { %v266_v3 = vsel %vm213_vm0, %v2021_v1, 0  ;;  %v263_v5 = vsel %vm213_vm0, %v2023_v4, 0  ;;  %v2027_v8 = vld [vmem:[%s2656_s0 + $0x20] sm:$0xff]   ;;  %v2029_v9 = vld [vmem:[%s2656_s0 + $0x18] sm:$0xff]   ;;  %v260_v11 = vsel %vm213_vm0, %v2025_v7, 0  ;;  %v2030_v16 = vld [vmem:[%s2656_s0 + $0x50] sm:$0xff]  }
   0x4   :  { %1971 = vmatpush3.bf16.xpose.msra.mxu0 %v266_v3  ;;  %v2026_v10 = vld [vmem:[%s2656_s0 + $0x60] sm:$0xff]   ;;  %v257_v13 = vsel %vm213_vm0, %v2027_v8, 0  ;;  %v254_v14 = vsel %vm213_vm0, %v2029_v9, 0  ;;  %v2028_v15 = vld [vmem:[%s2656_s0 + $0x58] sm:$0xff]  }
   0x5   :  { %2007 = vmatprep.subr.msk.bf16.mxu0 %vm213_vm0, %v2022_v2  ;;  %v2036_v12 = vld [vmem:[%s2657_s1] sm:$0xff]  }
   0x6   :  { %1986 = vmatprep.mubr.msk.bf16.mxu0 %vm213_vm0, %v2036_v12 }
   0xc   :  { %1973 = vmatpush3.bf16.xpose.msra.mxu0 %v263_v5 }
   0xd   :  { %2008 = vmatprep.subr.msk.bf16.mxu0 %vm213_vm0, %v2024_v6 }
  0x14   :  { %1975 = vmatpush3.bf16.xpose.msra.mxu0 %v260_v11 }
  0x15   :  { %2009 = vmatprep.subr.msk.bf16.mxu0 %vm213_vm0, %v2026_v10 }
  0x1c   :  { %1977 = vmatpush3.bf16.xpose.msra.mxu0 %v257_v13 }
  0x1d   :  { %2010 = vmatprep.subr.msk.bf16.mxu0 %vm213_vm0, %v2028_v15 }
  0x24   :  { %1979 = vmatpush3.bf16.xpose.msra.mxu0 %v254_v14 }
  0x25   :  { %13 = vsyncpa [#allocation3], 0  ;;  %2011 = vmatprep.subr.msk.bf16.mxu0 %vm213_vm0, %v2030_v16  ;;  %v2031_v17 = vld [vmem:[%s2656_s0 + $0x10] sm:$0xff]   ;;  %v2032_v19 = vld [vmem:[%s2656_s0 + $0x48] sm:$0xff]   ;;  %v2088_v27 = vmov 0   ;;  %s2089_s9 = smov [#allocation2]  }
  0x26   :  { %v251_v18 = vsel %vm213_vm0, %v2031_v17, 0  ;;  %v2033_v20 = vld [vmem:[%s2656_s0 + $0x8] sm:$0xff]   ;;  %v2034_v22 = vld [vmem:[%s2656_s0 + $0x40] sm:$0xff]   ;;  %v471_v26 = vld [vmem:[%s2659_s3 + $0x10] sm:$0xff]  ;;  %2018 = vset.pattern.permute.xlu0 %v2088_v27  ;;  %541 = vmatprep.mubr.bf16.mxu1 %v2088_v27  ;;  %s1808_s10 = sshll.u32 %s2089_s9, 4  ;;  %s1809_s10 = int_to_ptr.vmem [resolvable:$true] %s1808_s10 }
  0x27   :  { %v248_v21 = vsel %vm213_vm0, %v2033_v20, 0  ;;  %v2035_v23 = vld [vmem:[%s2656_s0] sm:$0xff]   ;;  %v2037_v25 = vld [vmem:[%s2657_s1 + $0x8] sm:$0xff]   ;;  %485 = vperm.xlu0 %2018, %v471_v26   ;;  %2019 = vset.pattern.permute.xlu1 %v2088_v27  ;;  %v472_v28 = vld [vmem:[%s2659_s3 + $0x18] sm:$0xff]  ;;  %s2066_s11 = scalar_lea.vmem %s1809_s10, 640  ;;  %p2071_p1 = scmp.lt.s32.totalorder %s1809_s10, %s1809_s10 }
  0x28   :  { %v245_v24 = vsel %vm213_vm0, %v2035_v23, 0  ;;  %v469_v29 = vld [vmem:[%s2659_s3] sm:$0xff]  ;;  %v657_v30 = vld [vmem:[%s2661_s5 + $0x10] sm:$0xff]  ;;  %v470_v32 = vld [vmem:[%s2659_s3 + $0x8] sm:$0xff]  ;;  %p2067_p0 = scmp.ne.s32.totalorder %s1809_s10, %s2066_s11  ;;  %p2072_p2 = scmp.lt.s32.totalorder %s2066_s11, %s2066_s11 }
  0x29   :  { %475 = vperm.xlu1 %2019, %v469_v29   ;;  %v655_v31 = vld [vmem:[%s2661_s5] sm:$0xff]  ;;  %v658_v33 = vld [vmem:[%s2661_s5 + $0x18] sm:$0xff]  ;;  %v1869_v34 = vld [vmem:[%s2659_s3 + $0x30] sm:$0xff] }
  0x2a   :  { %v656_v35 = vld [vmem:[%s2661_s5 + $0x8] sm:$0xff]  ;;  %v1867_v36 = vld [vmem:[%s2659_s3 + $0x20] sm:$0xff]  ;;  %v1870_v37 = vld [vmem:[%s2659_s3 + $0x38] sm:$0xff]  ;;  %p2073_p3 = por %p2072_p2, %p2071_p1 }
  0x2b   :  { %490 = vperm.xlu0 %2018, %v472_v28   ;;  %v1885_v38 = vld [vmem:[%s2661_s5 + $0x30] sm:$0xff]  ;;  %v1868_v39 = vld [vmem:[%s2659_s3 + $0x28] sm:$0xff]  ;;  %v1883_v40 = vld [vmem:[%s2661_s5 + $0x20] sm:$0xff] }
  0x2c   :  { %1981 = vmatpush3.bf16.xpose.msra.mxu0 %v251_v18  ;;  %v1886_v41 = vld [vmem:[%s2661_s5 + $0x38] sm:$0xff]  ;;  %v1893_v42 = vld [vmem:[%s2659_s3 + $0x50] sm:$0xff]  ;;  %v1884_v43 = vld [vmem:[%s2661_s5 + $0x28] sm:$0xff]  ;;  %p2074_p4 = pnand %p2073_p3, %p2067_p0 }
  0x2d   :  { %2012 = vmatprep.subr.msk.bf16.mxu0 %vm213_vm0, %v2032_v19  ;;  %480 = vperm.xlu1 %2019, %v470_v32   ;;  %v1891_v44 = vld [vmem:[%s2659_s3 + $0x40] sm:$0xff]  ;;  %v1894_v45 = vld [vmem:[%s2659_s3 + $0x58] sm:$0xff]  ;;  %v1909_v46 = vld [vmem:[%s2661_s5 + $0x50] sm:$0xff] }
  0x2e   :  { %v1892_v47 = vld [vmem:[%s2659_s3 + $0x48] sm:$0xff]  ;;  %v1907_v48 = vld [vmem:[%s2661_s5 + $0x40] sm:$0xff]  ;;  %v1910_v49 = vld [vmem:[%s2661_s5 + $0x58] sm:$0xff] }
  0x2f   :  { %671 = vperm.xlu0 %2018, %v657_v30   ;;  %v1917_v50 = vld [vmem:[%s2659_s3 + $0x70] sm:$0xff]  ;;  %v1908_v51 = vld [vmem:[%s2661_s5 + $0x48] sm:$0xff]  ;;  %v1915_v52 = vld [vmem:[%s2659_s3 + $0x60] sm:$0xff] }
  0x30   :  { %v1918_v53 = vld [vmem:[%s2659_s3 + $0x78] sm:$0xff]  ;;  %v1933_v54 = vld [vmem:[%s2661_s5 + $0x70] sm:$0xff]  ;;  %v1916_v55 = vld [vmem:[%s2659_s3 + $0x68] sm:$0xff] }
  0x31   :  { %676 = vperm.xlu1 %2019, %v658_v33   ;;  %v1931_v56 = vld [vmem:[%s2661_s5 + $0x60] sm:$0xff]  ;;  %v1934_v57 = vld [vmem:[%s2661_s5 + $0x78] sm:$0xff]  ;;  %v1941_v58 = vld [vmem:[%s2659_s3 + $0x90] sm:$0xff] }
  0x32   :  { %v1932_v59 = vld [vmem:[%s2661_s5 + $0x68] sm:$0xff]  ;;  %v1939_v60 = vld [vmem:[%s2659_s3 + $0x80] sm:$0xff]  ;;  %v1942_v61 = vld [vmem:[%s2659_s3 + $0x98] sm:$0xff] }
  0x33   :  { %661 = vperm.xlu0 %2018, %v655_v31   ;;  %v1957_v62 = vld [vmem:[%s2661_s5 + $0x90] sm:$0xff]  ;;  %v1940_v63 = vld [vmem:[%s2659_s3 + $0x88] sm:$0xff]  ;;  %v1955_v0 = vld [vmem:[%s2661_s5 + $0x80] sm:$0xff] }
  0x34   :  { %1983 = vmatpush3.bf16.xpose.msra.mxu0 %v248_v21  ;;  %v1958_v1 = vld [vmem:[%s2661_s5 + $0x98] sm:$0xff]  ;;  %v1716_v2 = vld [vmem:[%s2663_s7] sm:$0xff]  ;;  %v1956_v3 = vld [vmem:[%s2661_s5 + $0x88] sm:$0xff] }
  0x35   :  { %2013 = vmatprep.subr.msk.bf16.mxu0 %vm213_vm0, %v2034_v22  ;;  %666 = vperm.xlu1 %2019, %v656_v35  }
  0x37   :  { %737 = vperm.xlu0 %2018, %v1869_v34  }
  0x39   :  { %742 = vperm.xlu1 %2019, %v1870_v37   ;;  %v2038_v37 = vld [vmem:[%s2658_s2] sm:$0xff]  }
  0x3b   :  { %727 = vperm.xlu0 %2018, %v1867_v36  }
  0x3c   :  { %1985 = vmatpush3.bf16.xpose.msra.mxu0 %v245_v24 }
  0x3d   :  { %732 = vperm.xlu1 %2019, %v1868_v39   ;;  %v2040_v39 = vld [vmem:[%s2657_s1 + $0x10] sm:$0xff]  }
  0x3f   :  { %925 = vperm.xlu0 %2018, %v1885_v38   ;;  %v2039_v38 = vld [vmem:[%s2658_s2 + $0x8] sm:$0xff]  }
  0x41   :  { %930 = vperm.xlu1 %2019, %v1886_v41  }
  0x43   :  { %1987 = vmatmul.mubr.msk.bf16.vlgmr.msra.gmra.mxu0 %vm213_vm0, %v2036_v12  ;;  %915 = vperm.xlu0 %2018, %v1883_v40   ;;  %v2042_v40 = vld [vmem:[%s2657_s1 + $0x18] sm:$0xff]  }
  0x44   :  { %1988 = vmatprep.mubr.msk.bf16.mxu0 %vm213_vm0, %v2037_v25 }
  0x45   :  { %920 = vperm.xlu1 %2019, %v1884_v43  }
  0x47   :  { %991 = vperm.xlu0 %2018, %v1893_v42  }
  0x49   :  { %996 = vperm.xlu1 %2019, %v1894_v45  }
  0x4b   :  { %1989 = vmatmul.mubr.msk.bf16.gmra.mxu0 %vm213_vm0, %v2037_v25  ;;  %981 = vperm.xlu0 %2018, %v1891_v44  }
  0x4c   :  { %1990 = vmatprep.mubr.msk.bf16.mxu0 %vm213_vm0, %v2040_v39 }
  0x4d   :  { %986 = vperm.xlu1 %2019, %v1892_v47  }
  0x4f   :  { %1179 = vperm.xlu0 %2018, %v1909_v46  }
  0x51   :  { %1184 = vperm.xlu1 %2019, %v1910_v49  }
  0x53   :  { %1169 = vperm.xlu0 %2018, %v1907_v48   ;;  %1991 = vmatmul.mubr.msk.bf16.gmra.mxu0 %vm213_vm0, %v2040_v39 }
  0x54   :  { %1992 = vmatprep.mubr.msk.bf16.mxu0 %vm213_vm0, %v2042_v40 }
  0x55   :  { %1174 = vperm.xlu1 %2019, %v1908_v51  }
  0x57   :  { %1245 = vperm.xlu0 %2018, %v1917_v50  }
  0x59   :  { %1250 = vperm.xlu1 %2019, %v1918_v53  }
  0x5b   :  { %1235 = vperm.xlu0 %2018, %v1915_v52   ;;  %1993 = vmatmul.mubr.msk.bf16.gmra.mxu0 %vm213_vm0, %v2042_v40 }
  0x5d   :  { %1240 = vperm.xlu1 %2019, %v1916_v55  }
  0x5f   :  { %1433 = vperm.xlu0 %2018, %v1933_v54  }
  0x61   :  { %1438 = vperm.xlu1 %2019, %v1934_v57  }
  0x63   :  { %1423 = vperm.xlu0 %2018, %v1931_v56  }
  0x65   :  { %1428 = vperm.xlu1 %2019, %v1932_v59  }
  0x67   :  { %1499 = vperm.xlu0 %2018, %v1941_v58  }
  0x69   :  { %1504 = vperm.xlu1 %2019, %v1942_v61  }
  0x6b   :  { %1489 = vperm.xlu0 %2018, %v1939_v60  }
  0x6d   :  { %1494 = vperm.xlu1 %2019, %v1940_v63  }
  0x6f   :  { %1687 = vperm.xlu0 %2018, %v1957_v62  }
  0x71   :  { %1692 = vperm.xlu1 %2019, %v1958_v1  }
  0x73   :  { %1677 = vperm.xlu0 %2018, %v1955_v0  }
  0x75   :  { %1682 = vperm.xlu1 %2019, %v1956_v3  }
  0x77   :  { %1719 = vperm.xlu0 %2018, %v1716_v2  }
  0xa2   :  { %v486_v44 = vpop.permute.xlu0 %485 }
  0xa4   :  { %v476_v45 = vpop.permute.xlu1 %475 }
  0xa6   :  { %v491_v49 = vpop.permute.xlu0 %490 }
  0xa8   :  { %v481_v50 = vpop.permute.xlu1 %480 }
 0x103   :  { %v326_v4 = vpop.f32.mrf.mxu0 }
 0x105   :  { %v328_v5 = vpop.f32.mrf.mxu0 }
 0x107   :  { %v330_v6 = vpop.f32.mrf.mxu0 }
 0x108   :  { %v2341_v13 = vpack.c.bf16 %v330_v6, %v326_v4 }
 0x109   :  { %v332_v7 = vpop.f32.mrf.mxu0 }
 0x10a   :  { %v2337_v9 = vpack.c.bf16 %v332_v7, %v328_v5  ;;  %v445_v22 = vunpack.c.l.bf16 %v2341_v13  ;;  %v447_v23 = vunpack.c.h.bf16 %v2341_v13 }
 0x10b   :  { %v336_v8 = vpop.f32.mrf.mxu0 }
 0x10c   :  { %v446_v14 = vunpack.c.l.bf16 %v2337_v9  ;;  %v448_v16 = vunpack.c.h.bf16 %v2337_v9  ;;  %v453_v32 = vmax.f32 %v445_v22, 0.0  ;;  %v455_v33 = vmax.f32 %v447_v23, 0.0 }
 0x10d   :  { %v338_v10 = vpop.f32.mrf.mxu0 }
 0x10e   :  { %v454_v26 = vmax.f32 %v446_v14, 0.0  ;;  %v456_v28 = vmax.f32 %v448_v16, 0.0  ;;  %v461_v36 = vpack.c.bf16 %v455_v33, %v453_v32 }
 0x10f   :  { %v340_v11 = vpop.f32.mrf.mxu0 }
 0x110   :  { %v2339_v12 = vpack.c.bf16 %v340_v11, %v336_v8  ;;  %v462_v35 = vpack.c.bf16 %v456_v28, %v454_v26  ;;  %v2043_v11 = vld [vmem:[%s2660_s4 + $0x8] sm:$0xff]  }
 0x111   :  { %v342_v15 = vpop.f32.mrf.mxu0 }
 0x112   :  { %v449_v17 = vunpack.c.l.bf16 %v2339_v12  ;;  %v451_v18 = vunpack.c.h.bf16 %v2339_v12  ;;  %v2347_v19 = vpack.c.bf16 %v342_v15, %v338_v10  ;;  %v2041_v10 = vld [vmem:[%s2660_s4] sm:$0xff]  }
 0x113   :  { %v346_v15 = vpop.f32.mrf.mxu0 }
 0x114   :  { %v450_v20 = vunpack.c.l.bf16 %v2347_v19  ;;  %v452_v21 = vunpack.c.h.bf16 %v2347_v19  ;;  %v457_v24 = vmax.f32 %v449_v17, 0.0  ;;  %v459_v25 = vmax.f32 %v451_v18, 0.0 }
 0x116   :  { %v458_v29 = vmax.f32 %v450_v20, 0.0  ;;  %v460_v30 = vmax.f32 %v452_v21, 0.0  ;;  %v463_v34 = vpack.c.bf16 %v459_v25, %v457_v24  ;;  %v348_v24 = vpop.f32.mrf.mxu0 }
 0x118   :  { %v464_v31 = vpack.c.bf16 %v460_v30, %v458_v29  ;;  %v350_v25 = vpop.f32.mrf.mxu0 }
 0x11a   :  { %521 = vmatprep.subr.bf16.mxu1 %v464_v31  ;;  %v352_v26 = vpop.f32.mrf.mxu0 }
 0x11b   :  { %522 = vmatpush1.bf16.msra.mxu1 %v463_v34  ;;  %v677_v34 = vpop.permute.xlu1 %676  ;;  %v430_v39 = vpack.c.bf16 %v352_v26, %v348_v24 }
 0x11c   :  { %523 = vmatprep.subr.bf16.mxu1 %v462_v35  ;;  %v356_v28 = vpop.f32.mrf.mxu0 }
 0x11e   :  { %v358_v30 = vpop.f32.mrf.mxu0 }
 0x11f   :  { %524 = vmatpush1.bf16.msra.mxu1 %v461_v36  ;;  %v672_v36 = vpop.permute.xlu0 %671 }
 0x120   :  { %v360_v33 = vpop.f32.mrf.mxu0 }
 0x122   :  { %1857 = vmatmul.mubr.msk.bf16.vlgmr.msra.gmra.mxu1 %vm213_vm0, %v2038_v37  ;;  %v362_v37 = vpop.f32.mrf.mxu0 }
 0x123   :  { %551 = vmatprep.mubr.bf16.mxu1 %v2088_v27 }
 0x12a   :  { %1858 = vmatmul.mubr.msk.bf16.gmra.mxu1 %vm213_vm0, %v2039_v38 }
 0x12b   :  { %626 = vmatprep.mubr.bf16.mxu1 %v2088_v27 }
 0x1e2   :  { %v543_v41 = vpop.f32.mrf.mxu1 }
 0x1e3   :  { %v544_v0 = vadd.f32 %v543_v41, %v476_v45  ;;  %v431_v41 = vpack.c.bf16 %v360_v33, %v356_v28 }
 0x1e4   :  { %v545_v42 = vpop.f32.mrf.mxu1 }
 0x1e5   :  { %v546_v57 = vadd.f32 %v545_v42, %v476_v45  ;;  %v562_v7 = vmax.f32 %v544_v0, 0.0  ;;  %v432_v45 = vpack.c.bf16 %v362_v37, %v358_v30  ;;  %v2045_v30 = vld [vmem:[%s2658_s2 + $0x18] sm:$0xff]  }
 0x1e6   :  { %v547_v43 = vpop.f32.mrf.mxu1 }
 0x1e7   :  { %v548_v59 = vadd.f32 %v547_v43, %v481_v50  ;;  %v563_v2 = vmax.f32 %v546_v57, 0.0  ;;  %v692_v57 = vunpack.c.l.bf16 %v432_v45 }
 0x1e8   :  { %v549_v46 = vpop.f32.mrf.mxu1 }
 0x1e9   :  { %v550_v52 = vadd.f32 %v549_v46, %v481_v50  ;;  %v564_v4 = vmax.f32 %v548_v59, 0.0  ;;  %v688_v59 = vunpack.c.l.bf16 %v430_v39 }
 0x1ea   :  { %v553_v47 = vpop.f32.mrf.mxu1 }
 0x1eb   :  { %v554_v55 = vadd.f32 %v553_v47, %v486_v44  ;;  %v565_v61 = vmax.f32 %v550_v52, 0.0  ;;  %v570_v8 = vpack.c.bf16 %v564_v4, %v562_v7  ;;  %v667_v47 = vpop.permute.xlu1 %666 }
 0x1ec   :  { %v555_v48 = vpop.f32.mrf.mxu1 }
 0x1ed   :  { %v556_v53 = vadd.f32 %v555_v48, %v486_v44  ;;  %v566_v1 = vmax.f32 %v554_v55, 0.0  ;;  %v571_v6 = vpack.c.bf16 %v565_v61, %v563_v2  ;;  %v429_v48 = vpack.c.bf16 %v350_v25, %v346_v15 }
 0x1ee   :  { %v557_v51 = vpop.f32.mrf.mxu1  ;;  %v694_v61 = vunpack.c.h.bf16 %v432_v45 }
 0x1ef   :  { %v558_v54 = vadd.f32 %v557_v51, %v491_v49  ;;  %v567_v62 = vmax.f32 %v556_v53, 0.0  ;;  %v690_v51 = vunpack.c.h.bf16 %v430_v39  ;;  %v662_v53 = vpop.permute.xlu0 %661 }
 0x1f0   :  { %v559_v56 = vpop.f32.mrf.mxu1 }
 0x1f1   :  { %v560_v58 = vadd.f32 %v559_v56, %v491_v49  ;;  %v568_v60 = vmax.f32 %v558_v54, 0.0  ;;  %v693_v54 = vunpack.c.h.bf16 %v431_v41 }
 0x1f3   :  { %v569_v63 = vmax.f32 %v560_v58, 0.0  ;;  %v572_v5 = vpack.c.bf16 %v568_v60, %v566_v1 }
 0x1f5   :  { %v573_v3 = vpack.c.bf16 %v569_v63, %v567_v62  ;;  %v689_v63 = vunpack.c.h.bf16 %v429_v48 }
 0x1f7   :  { %606 = vmatprep.subr.bf16.mxu1 %v573_v3 }
 0x1f8   :  { %607 = vmatpush1.bf16.msra.mxu1 %v572_v5 }
 0x1f9   :  { %608 = vmatprep.subr.bf16.mxu1 %v571_v6 }
 0x1fc   :  { %609 = vmatpush1.bf16.msra.mxu1 %v570_v8 }
 0x1ff   :  { %1861 = vmatmul.mubr.msk.bf16.vlgmr.msra.gmra.mxu1 %vm213_vm0, %v2041_v10 }
 0x200   :  { %636 = vmatprep.mubr.bf16.mxu1 %v2088_v27 }
 0x207   :  { %1862 = vmatmul.mubr.msk.bf16.gmra.mxu1 %vm213_vm0, %v2043_v11 }
 0x208   :  { %793 = vmatprep.mubr.bf16.mxu1 %v2088_v27 }
 0x2bf   :  { %v628_v29 = vpop.f32.mrf.mxu1 }
 0x2c0   :  { %v647_v9 = vadd.f32 %v628_v29, %v445_v22  ;;  %v687_v22 = vunpack.c.l.bf16 %v429_v48  ;;  %v2044_v29 = vld [vmem:[%s2658_s2 + $0x10] sm:$0xff]  }
 0x2c1   :  { %v630_v31 = vpop.f32.mrf.mxu1 }
 0x2c2   :  { %v648_v44 = vadd.f32 %v630_v31, %v446_v14  ;;  %v691_v14 = vunpack.c.l.bf16 %v431_v41  ;;  %v679_v0 = vadd.f32 %v662_v53, %v647_v9  ;;  %v2046_v31 = vld [vmem:[%s2657_s1 + $0x20] sm:$0xff]  }
 0x2c3   :  { %v632_v32 = vpop.f32.mrf.mxu1  ;;  %1994 = vmatprep.mubr.msk.bf16.mxu0 %vm213_vm0, %v2046_v31 }
 0x2c4   :  { %v649_v49 = vadd.f32 %v632_v32, %v447_v23  ;;  %v680_v56 = vadd.f32 %v662_v53, %v648_v44  ;;  %v2433_v7 = vadd.f32 %v687_v22, %v679_v0  ;;  %1995 = vmatmul.mubr.msk.bf16.gmra.mxu0 %vm213_vm0, %v2046_v31  ;;  %v2048_v32 = vld [vmem:[%s2657_s1 + $0x28] sm:$0xff]  }
 0x2c5   :  { %v634_v35 = vpop.f32.mrf.mxu1  ;;  %1996 = vmatprep.mubr.msk.bf16.mxu0 %vm213_vm0, %v2048_v32 }
 0x2c6   :  { %v650_v40 = vadd.f32 %v634_v35, %v448_v16  ;;  %v681_v60 = vadd.f32 %v667_v47, %v649_v49  ;;  %v2423_v2 = vadd.f32 %v688_v59, %v680_v56  ;;  %v703_v26 = vmax.f32 %v2433_v7, 0.0  ;;  %v2047_v59 = vld [vmem:[%s2660_s4 + $0x10] sm:$0xff]  }
 0x2c7   :  { %v638_v38 = vpop.f32.mrf.mxu1 }
 0x2c8   :  { %v651_v42 = vadd.f32 %v638_v38, %v449_v17  ;;  %v682_v16 = vadd.f32 %v667_v47, %v650_v40  ;;  %v2427_v19 = vadd.f32 %v689_v63, %v681_v60  ;;  %v704_v11 = vmax.f32 %v2423_v2, 0.0  ;;  %v738_v38 = vpop.permute.xlu0 %737  ;;  %v2049_v60 = vld [vmem:[%s2660_s4 + $0x18] sm:$0xff]  }
 0x2c9   :  { %v640_v43 = vpop.f32.mrf.mxu1 }
 0x2ca   :  { %v652_v46 = vadd.f32 %v640_v43, %v450_v20  ;;  %v683_v55 = vadd.f32 %v672_v36, %v651_v42  ;;  %v2415_v62 = vadd.f32 %v690_v51, %v682_v16  ;;  %v705_v15 = vmax.f32 %v2427_v19, 0.0 }
 0x2cb   :  { %v642_v50 = vpop.f32.mrf.mxu1 }
 0x2cc   :  { %v684_v52 = vadd.f32 %v672_v36, %v652_v46  ;;  %v653_v17 = vadd.f32 %v642_v50, %v451_v18  ;;  %v2421_v1 = vadd.f32 %v691_v14, %v683_v55  ;;  %v706_v6 = vmax.f32 %v2415_v62, 0.0  ;;  %1997 = vmatmul.mubr.msk.bf16.gmra.mxu0 %vm213_vm0, %v2048_v32  ;;  %v743_v36 = vpop.permute.xlu1 %742  ;;  %v728_v46 = vpop.permute.xlu0 %727 }
 0x2cd   :  { %v644_v20 = vpop.f32.mrf.mxu1  ;;  %v711_v28 = vpack.c.bf16 %v705_v15, %v703_v26 }
 0x2ce   :  { %v685_v58 = vadd.f32 %v677_v34, %v653_v17  ;;  %v654_v23 = vadd.f32 %v644_v20, %v452_v21  ;;  %v2417_v12 = vadd.f32 %v692_v57, %v684_v52  ;;  %v707_v8 = vmax.f32 %v2421_v1, 0.0 }
 0x2cf   :  { %v712_v25 = vpack.c.bf16 %v706_v6, %v704_v11 }
 0x2d0   :  { %v2419_v18 = vadd.f32 %v693_v54, %v685_v58  ;;  %v686_v13 = vadd.f32 %v677_v34, %v654_v23  ;;  %v708_v4 = vmax.f32 %v2417_v12, 0.0  ;;  %v733_v41 = vpop.permute.xlu1 %732  ;;  %v926_v15 = vpop.permute.xlu0 %925 }
 0x2d2   :  { %v2425_v3 = vadd.f32 %v694_v61, %v686_v13  ;;  %v709_v21 = vmax.f32 %v2419_v18, 0.0 }
 0x2d4   :  { %v710_v5 = vmax.f32 %v2425_v3, 0.0  ;;  %v713_v24 = vpack.c.bf16 %v709_v21, %v707_v8 }
 0x2d6   :  { %v714_v10 = vpack.c.bf16 %v710_v5, %v708_v4 }
 0x2d8   :  { %773 = vmatprep.subr.bf16.mxu1 %v714_v10  ;;  %v931_v10 = vpop.permute.xlu1 %930 }
 0x2d9   :  { %774 = vmatpush1.bf16.msra.mxu1 %v713_v24 }
 0x2da   :  { %775 = vmatprep.subr.bf16.mxu1 %v712_v25 }
 0x2dd   :  { %776 = vmatpush1.bf16.msra.mxu1 %v711_v28 }
 0x2e0   :  { %1873 = vmatmul.mubr.msk.bf16.vlgmr.msra.gmra.mxu1 %vm213_vm0, %v2044_v29 }
 0x2e1   :  { %803 = vmatprep.mubr.bf16.mxu1 %v2088_v27 }
 0x2e8   :  { %1874 = vmatmul.mubr.msk.bf16.gmra.mxu1 %vm213_vm0, %v2045_v30 }
 0x2e9   :  { %879 = vmatprep.mubr.bf16.mxu1 %v2088_v27 }
 0x384   :  { %v366_v61 = vpop.f32.mrf.mxu0 }
 0x386   :  { %v368_v13 = vpop.f32.mrf.mxu0 }
 0x388   :  { %v370_v22 = vpop.f32.mrf.mxu0 }
 0x38a   :  { %v372_v63 = vpop.f32.mrf.mxu0 }
 0x38b   :  { %v434_v26 = vpack.c.bf16 %v372_v63, %v368_v13 }
 0x38c   :  { %v376_v0 = vpop.f32.mrf.mxu0 }
 0x38e   :  { %v378_v4 = vpop.f32.mrf.mxu0 }
 0x390   :  { %v380_v8 = vpop.f32.mrf.mxu0 }
 0x391   :  { %v435_v29 = vpack.c.bf16 %v380_v8, %v376_v0 }
 0x392   :  { %v382_v24 = vpop.f32.mrf.mxu0 }
 0x3a0   :  { %v795_v33 = vpop.f32.mrf.mxu1 }
 0x3a1   :  { %v796_v9 = vadd.f32 %v795_v33, %v728_v46  ;;  %v436_v33 = vpack.c.bf16 %v382_v24, %v378_v4  ;;  %v2051_v4 = vld [vmem:[%s2658_s2 + $0x28] sm:$0xff]  }
 0x3a2   :  { %v797_v34 = vpop.f32.mrf.mxu1 }
 0x3a3   :  { %v798_v49 = vadd.f32 %v797_v34, %v728_v46  ;;  %v814_v58 = vmax.f32 %v796_v9, 0.0 }
 0x3a4   :  { %v799_v35 = vpop.f32.mrf.mxu1 }
 0x3a5   :  { %v800_v51 = vadd.f32 %v799_v35, %v733_v41  ;;  %v815_v54 = vmax.f32 %v798_v49, 0.0  ;;  %v921_v35 = vpop.permute.xlu1 %920  ;;  %v942_v49 = vunpack.c.l.bf16 %v434_v26 }
 0x3a6   :  { %v801_v37 = vpop.f32.mrf.mxu1 }
 0x3a7   :  { %v802_v43 = vadd.f32 %v801_v37, %v733_v41  ;;  %v816_v20 = vmax.f32 %v800_v51, 0.0 }
 0x3a8   :  { %v805_v39 = vpop.f32.mrf.mxu1 }
 0x3a9   :  { %v806_v47 = vadd.f32 %v805_v39, %v738_v38  ;;  %v817_v52 = vmax.f32 %v802_v43, 0.0  ;;  %v822_v23 = vpack.c.bf16 %v816_v20, %v814_v58  ;;  %v944_v39 = vunpack.c.h.bf16 %v434_v26 }
 0x3aa   :  { %v807_v40 = vpop.f32.mrf.mxu1 }
 0x3ab   :  { %v808_v44 = vadd.f32 %v807_v40, %v738_v38  ;;  %v818_v14 = vmax.f32 %v806_v47, 0.0  ;;  %v823_v57 = vpack.c.bf16 %v817_v52, %v815_v54  ;;  %v946_v47 = vunpack.c.l.bf16 %v436_v33 }
 0x3ac   :  { %v809_v42 = vpop.f32.mrf.mxu1 }
 0x3ad   :  { %v810_v45 = vadd.f32 %v809_v42, %v743_v36  ;;  %v819_v17 = vmax.f32 %v808_v44, 0.0  ;;  %v947_v44 = vunpack.c.h.bf16 %v435_v29 }
 0x3ae   :  { %v811_v48 = vpop.f32.mrf.mxu1 }
 0x3af   :  { %v812_v50 = vadd.f32 %v811_v48, %v743_v36  ;;  %v820_v16 = vmax.f32 %v810_v45, 0.0  ;;  %v433_v36 = vpack.c.bf16 %v370_v22, %v366_v61 }
 0x3b1   :  { %v821_v53 = vmax.f32 %v812_v50, 0.0  ;;  %v824_v56 = vpack.c.bf16 %v820_v16, %v818_v14  ;;  %v948_v50 = vunpack.c.h.bf16 %v436_v33 }
 0x3b3   :  { %v825_v55 = vpack.c.bf16 %v821_v53, %v819_v17  ;;  %v943_v17 = vunpack.c.h.bf16 %v433_v36 }
 0x3b5   :  { %859 = vmatprep.subr.bf16.mxu1 %v825_v55 }
 0x3b6   :  { %860 = vmatpush1.bf16.msra.mxu1 %v824_v56 }
 0x3b7   :  { %861 = vmatprep.subr.bf16.mxu1 %v823_v57 }
 0x3ba   :  { %862 = vmatpush1.bf16.msra.mxu1 %v822_v23 }
 0x3bd   :  { %1881 = vmatmul.mubr.msk.bf16.vlgmr.msra.gmra.mxu1 %vm213_vm0, %v2047_v59 }
 0x3be   :  { %889 = vmatprep.mubr.bf16.mxu1 %v2088_v27 }
 0x3c5   :  { %1882 = vmatmul.mubr.msk.bf16.gmra.mxu1 %vm213_vm0, %v2049_v60 }
 0x3c6   :  { %1047 = vmatprep.mubr.bf16.mxu1 %v2088_v27 }
 0x47d   :  { %v881_v21 = vpop.f32.mrf.mxu1 }
 0x47e   :  { %v900_v43 = vadd.f32 %v881_v21, %v2433_v7  ;;  %v941_v7 = vunpack.c.l.bf16 %v433_v36  ;;  %v2050_v21 = vld [vmem:[%s2658_s2 + $0x20] sm:$0xff]  }
 0x47f   :  { %v883_v5 = vpop.f32.mrf.mxu1 }
 0x480   :  { %v901_v32 = vadd.f32 %v883_v5, %v2423_v2  ;;  %v2052_v5 = vld [vmem:[%s2657_s1 + $0x30] sm:$0xff]  }
 0x481   :  { %v885_v6 = vpop.f32.mrf.mxu1  ;;  %1998 = vmatprep.mubr.msk.bf16.mxu0 %vm213_vm0, %v2052_v5 }
 0x482   :  { %v902_v37 = vadd.f32 %v885_v6, %v2427_v19  ;;  %1999 = vmatmul.mubr.msk.bf16.gmra.mxu0 %vm213_vm0, %v2052_v5  ;;  %v2054_v6 = vld [vmem:[%s2657_s1 + $0x38] sm:$0xff]  }
 0x483   :  { %v887_v11 = vpop.f32.mrf.mxu1  ;;  %2000 = vmatprep.mubr.msk.bf16.mxu0 %vm213_vm0, %v2054_v6 }
 0x484   :  { %v903_v28 = vadd.f32 %v887_v11, %v2415_v62  ;;  %v916_v62 = vpop.permute.xlu0 %915  ;;  %v935_v19 = vadd.f32 %v921_v35, %v902_v37 }
 0x485   :  { %v891_v25 = vpop.f32.mrf.mxu1  ;;  %v934_v46 = vadd.f32 %v916_v62, %v901_v32  ;;  %v933_v53 = vadd.f32 %v916_v62, %v900_v43 }
 0x486   :  { %v904_v30 = vadd.f32 %v891_v25, %v2421_v1  ;;  %v936_v40 = vadd.f32 %v921_v35, %v903_v28  ;;  %v945_v1 = vunpack.c.l.bf16 %v435_v29 }
 0x487   :  { %v893_v31 = vpop.f32.mrf.mxu1  ;;  %v2485_v14 = vadd.f32 %v942_v49, %v934_v46  ;;  %v2495_v58 = vadd.f32 %v941_v7, %v933_v53  ;;  %v2053_v49 = vld [vmem:[%s2660_s4 + $0x20] sm:$0xff]  }
 0x488   :  { %v905_v34 = vadd.f32 %v893_v31, %v2417_v12  ;;  %v937_v45 = vadd.f32 %v926_v15, %v904_v30  ;;  %v2477_v51 = vadd.f32 %v944_v39, %v936_v40  ;;  %v992_v25 = vpop.permute.xlu0 %991 }
 0x489   :  { %v895_v38 = vpop.f32.mrf.mxu1  ;;  %v958_v60 = vmax.f32 %v2485_v14, 0.0  ;;  %v957_v63 = vmax.f32 %v2495_v58, 0.0 }
 0x48a   :  { %v938_v41 = vadd.f32 %v926_v15, %v905_v34  ;;  %v906_v42 = vadd.f32 %v895_v38, %v2419_v18  ;;  %v2483_v9 = vadd.f32 %v945_v1, %v937_v45  ;;  %v960_v57 = vmax.f32 %v2477_v51, 0.0  ;;  %2001 = vmatmul.mubr.msk.bf16.gmra.mxu0 %vm213_vm0, %v2054_v6  ;;  %v997_v15 = vpop.permute.xlu1 %996 }
 0x48b   :  { %v897_v2 = vpop.f32.mrf.mxu1 }
 0x48c   :  { %v939_v12 = vadd.f32 %v931_v10, %v906_v42  ;;  %v907_v48 = vadd.f32 %v897_v2, %v2425_v3  ;;  %v2479_v16 = vadd.f32 %v946_v47, %v938_v41  ;;  %v2489_v3 = vadd.f32 %v943_v17, %v935_v19  ;;  %v982_v34 = vpop.permute.xlu0 %981  ;;  %v2055_v19 = vld [vmem:[%s2660_s4 + $0x28] sm:$0xff]  }
 0x48d   :  { %v961_v23 = vmax.f32 %v2483_v9, 0.0  ;;  %v966_v22 = vpack.c.bf16 %v960_v57, %v958_v60 }
 0x48e   :  { %v2481_v18 = vadd.f32 %v947_v44, %v939_v12  ;;  %v940_v52 = vadd.f32 %v931_v10, %v907_v48  ;;  %v962_v20 = vmax.f32 %v2479_v16, 0.0  ;;  %v959_v61 = vmax.f32 %v2489_v3, 0.0  ;;  %v987_v29 = vpop.permute.xlu1 %986 }
 0x490   :  { %v2487_v54 = vadd.f32 %v948_v50, %v940_v52  ;;  %v963_v55 = vmax.f32 %v2481_v18, 0.0  ;;  %v965_v0 = vpack.c.bf16 %v959_v61, %v957_v63  ;;  %v1180_v61 = vpop.permute.xlu0 %1179 }
 0x492   :  { %v964_v56 = vmax.f32 %v2487_v54, 0.0  ;;  %v967_v13 = vpack.c.bf16 %v963_v55, %v961_v23 }
 0x494   :  { %v968_v59 = vpack.c.bf16 %v964_v56, %v962_v20 }
 0x496   :  { %1027 = vmatprep.subr.bf16.mxu1 %v968_v59  ;;  %v1185_v59 = vpop.permute.xlu1 %1184 }
 0x497   :  { %1028 = vmatpush1.bf16.msra.mxu1 %v967_v13 }
 0x498   :  { %1029 = vmatprep.subr.bf16.mxu1 %v966_v22 }
 0x49b   :  { %1030 = vmatpush1.bf16.msra.mxu1 %v965_v0 }
 0x49e   :  { %1897 = vmatmul.mubr.msk.bf16.vlgmr.msra.gmra.mxu1 %vm213_vm0, %v2050_v21 }
 0x49f   :  { %1057 = vmatprep.mubr.bf16.mxu1 %v2088_v27 }
 0x4a6   :  { %1898 = vmatmul.mubr.msk.bf16.gmra.mxu1 %vm213_vm0, %v2051_v4 }
 0x4a7   :  { %1133 = vmatprep.mubr.bf16.mxu1 %v2088_v27 }
 0x542   :  { %v386_v50 = vpop.f32.mrf.mxu0 }
 0x544   :  { %v388_v52 = vpop.f32.mrf.mxu0 }
 0x546   :  { %v390_v7 = vpop.f32.mrf.mxu0 }
 0x548   :  { %v392_v17 = vpop.f32.mrf.mxu0 }
 0x549   :  { %v438_v63 = vpack.c.bf16 %v392_v17, %v388_v52 }
 0x54a   :  { %v396_v53 = vpop.f32.mrf.mxu0 }
 0x54c   :  { %v398_v20 = vpop.f32.mrf.mxu0 }
 0x54e   :  { %v400_v23 = vpop.f32.mrf.mxu0 }
 0x54f   :  { %v439_v21 = vpack.c.bf16 %v400_v23, %v396_v53 }
 0x550   :  { %v402_v13 = vpop.f32.mrf.mxu0 }
 0x55e   :  { %v1049_v8 = vpop.f32.mrf.mxu1 }
 0x55f   :  { %v1050_v43 = vadd.f32 %v1049_v8, %v982_v34  ;;  %v440_v8 = vpack.c.bf16 %v402_v13, %v398_v20  ;;  %v2057_v20 = vld [vmem:[%s2658_s2 + $0x38] sm:$0xff]  }
 0x560   :  { %v1051_v10 = vpop.f32.mrf.mxu1 }
 0x561   :  { %v1052_v37 = vadd.f32 %v1051_v10, %v982_v34  ;;  %v1068_v12 = vmax.f32 %v1050_v43, 0.0 }
 0x562   :  { %v1053_v11 = vpop.f32.mrf.mxu1 }
 0x563   :  { %v1054_v39 = vadd.f32 %v1053_v11, %v987_v29  ;;  %v1069_v44 = vmax.f32 %v1052_v37, 0.0  ;;  %v1175_v11 = vpop.permute.xlu1 %1174  ;;  %v1196_v37 = vunpack.c.l.bf16 %v438_v63 }
 0x564   :  { %v1055_v24 = vpop.f32.mrf.mxu1 }
 0x565   :  { %v1056_v31 = vadd.f32 %v1055_v24, %v987_v29  ;;  %v1070_v2 = vmax.f32 %v1054_v39, 0.0 }
 0x566   :  { %v1059_v26 = vpop.f32.mrf.mxu1 }
 0x567   :  { %v1060_v35 = vadd.f32 %v1059_v26, %v992_v25  ;;  %v1071_v41 = vmax.f32 %v1056_v31, 0.0  ;;  %v1076_v48 = vpack.c.bf16 %v1070_v2, %v1068_v12  ;;  %v1198_v26 = vunpack.c.h.bf16 %v438_v63 }
 0x568   :  { %v1061_v28 = vpop.f32.mrf.mxu1 }
 0x569   :  { %v1062_v32 = vadd.f32 %v1061_v28, %v992_v25  ;;  %v1072_v1 = vmax.f32 %v1060_v35, 0.0  ;;  %v1077_v47 = vpack.c.bf16 %v1071_v41, %v1069_v44  ;;  %v1200_v35 = vunpack.c.l.bf16 %v440_v8 }
 0x56a   :  { %v1063_v30 = vpop.f32.mrf.mxu1 }
 0x56b   :  { %v1064_v33 = vadd.f32 %v1063_v30, %v997_v15  ;;  %v1073_v42 = vmax.f32 %v1062_v32, 0.0  ;;  %v1201_v32 = vunpack.c.h.bf16 %v439_v21 }
 0x56c   :  { %v1065_v36 = vpop.f32.mrf.mxu1 }
 0x56d   :  { %v1066_v38 = vadd.f32 %v1065_v36, %v997_v15  ;;  %v1074_v40 = vmax.f32 %v1064_v33, 0.0  ;;  %v437_v15 = vpack.c.bf16 %v390_v7, %v386_v50 }
 0x56f   :  { %v1075_v62 = vmax.f32 %v1066_v38, 0.0  ;;  %v1078_v46 = vpack.c.bf16 %v1074_v40, %v1072_v1  ;;  %v1202_v38 = vunpack.c.h.bf16 %v440_v8 }
 0x571   :  { %v1079_v45 = vpack.c.bf16 %v1075_v62, %v1073_v42  ;;  %v1197_v42 = vunpack.c.h.bf16 %v437_v15 }
 0x573   :  { %1113 = vmatprep.subr.bf16.mxu1 %v1079_v45 }
 0x574   :  { %1114 = vmatpush1.bf16.msra.mxu1 %v1078_v46 }
 0x575   :  { %1115 = vmatprep.subr.bf16.mxu1 %v1077_v47 }
 0x578   :  { %1116 = vmatpush1.bf16.msra.mxu1 %v1076_v48 }
 0x57b   :  { %1905 = vmatmul.mubr.msk.bf16.vlgmr.msra.gmra.mxu1 %vm213_vm0, %v2053_v49 }
 0x57c   :  { %1143 = vmatprep.mubr.bf16.mxu1 %v2088_v27 }
 0x583   :  { %1906 = vmatmul.mubr.msk.bf16.gmra.mxu1 %vm213_vm0, %v2055_v19 }
 0x584   :  { %1301 = vmatprep.mubr.bf16.mxu1 %v2088_v27 }
 0x63b   :  { %v1135_v55 = vpop.f32.mrf.mxu1 }
 0x63c   :  { %v1154_v31 = vadd.f32 %v1135_v55, %v2495_v58  ;;  %v1195_v58 = vunpack.c.l.bf16 %v437_v15  ;;  %v2056_v55 = vld [vmem:[%s2658_s2 + $0x30] sm:$0xff]  }
 0x63d   :  { %v1137_v56 = vpop.f32.mrf.mxu1 }
 0x63e   :  { %v1155_v6 = vadd.f32 %v1137_v56, %v2485_v14  ;;  %v2058_v56 = vld [vmem:[%s2657_s1 + $0x40] sm:$0xff]  }
 0x63f   :  { %v1139_v57 = vpop.f32.mrf.mxu1  ;;  %2002 = vmatprep.mubr.msk.bf16.mxu0 %vm213_vm0, %v2058_v56 }
 0x640   :  { %v1156_v24 = vadd.f32 %v1139_v57, %v2489_v3  ;;  %2003 = vmatmul.mubr.msk.bf16.gmra.mxu0 %vm213_vm0, %v2058_v56  ;;  %v2060_v57 = vld [vmem:[%s2657_s1 + $0x48] sm:$0xff]  }
 0x641   :  { %v1141_v60 = vpop.f32.mrf.mxu1  ;;  %2004 = vmatprep.mubr.msk.bf16.mxu0 %vm213_vm0, %v2060_v57 }
 0x642   :  { %v1157_v0 = vadd.f32 %v1141_v60, %v2477_v51  ;;  %v1170_v51 = vpop.permute.xlu0 %1169  ;;  %v1189_v3 = vadd.f32 %v1175_v11, %v1156_v24 }
 0x643   :  { %v1145_v22 = vpop.f32.mrf.mxu1  ;;  %v1188_v34 = vadd.f32 %v1170_v51, %v1155_v6  ;;  %v1187_v62 = vadd.f32 %v1170_v51, %v1154_v31 }
 0x644   :  { %v1158_v4 = vadd.f32 %v1145_v22, %v2483_v9  ;;  %v1190_v28 = vadd.f32 %v1175_v11, %v1157_v0  ;;  %v1199_v9 = vunpack.c.l.bf16 %v439_v21 }
 0x645   :  { %v1147_v5 = vpop.f32.mrf.mxu1  ;;  %v2547_v1 = vadd.f32 %v1196_v37, %v1188_v34  ;;  %v2557_v12 = vadd.f32 %v1195_v58, %v1187_v62  ;;  %v2059_v37 = vld [vmem:[%s2660_s4 + $0x30] sm:$0xff]  }
 0x646   :  { %v1159_v10 = vadd.f32 %v1147_v5, %v2479_v16  ;;  %v1191_v33 = vadd.f32 %v1180_v61, %v1158_v4  ;;  %v2539_v39 = vadd.f32 %v1198_v26, %v1190_v28  ;;  %v1246_v22 = vpop.permute.xlu0 %1245 }
 0x647   :  { %v1149_v25 = vpop.f32.mrf.mxu1  ;;  %v1212_v19 = vmax.f32 %v2547_v1, 0.0  ;;  %v1211_v17 = vmax.f32 %v2557_v12, 0.0 }
 0x648   :  { %v1192_v29 = vadd.f32 %v1180_v61, %v1159_v10  ;;  %v1160_v30 = vadd.f32 %v1149_v25, %v2481_v18  ;;  %v2545_v43 = vadd.f32 %v1199_v9, %v1191_v33  ;;  %v1214_v47 = vmax.f32 %v2539_v39, 0.0  ;;  %2005 = vmatmul.mubr.msk.bf16.gmra.mxu0 %vm213_vm0, %v2060_v57  ;;  %v1251_v61 = vpop.permute.xlu1 %1250 }
 0x649   :  { %v1151_v14 = vpop.f32.mrf.mxu1  ;;  %1641 = vmatprep.mubr.bf16.mxu0 %v2088_v27 }
 0x64a   :  { %v1193_v16 = vadd.f32 %v1185_v59, %v1160_v30  ;;  %v1161_v36 = vadd.f32 %v1151_v14, %v2487_v54  ;;  %v2541_v40 = vadd.f32 %v1200_v35, %v1192_v29  ;;  %v2551_v54 = vadd.f32 %v1197_v42, %v1189_v3  ;;  %v1236_v10 = vpop.permute.xlu0 %1235  ;;  %v2061_v3 = vld [vmem:[%s2660_s4 + $0x38] sm:$0xff]  }
 0x64b   :  { %v1215_v48 = vmax.f32 %v2545_v43, 0.0  ;;  %v1220_v7 = vpack.c.bf16 %v1214_v47, %v1212_v19 }
 0x64c   :  { %v2543_v18 = vadd.f32 %v1201_v32, %v1193_v16  ;;  %v1194_v41 = vadd.f32 %v1185_v59, %v1161_v36  ;;  %v1216_v2 = vmax.f32 %v2541_v40, 0.0  ;;  %v1213_v50 = vmax.f32 %v2551_v54, 0.0  ;;  %v1241_v21 = vpop.permute.xlu1 %1240 }
 0x64e   :  { %v2549_v44 = vadd.f32 %v1202_v38, %v1194_v41  ;;  %v1217_v45 = vmax.f32 %v2543_v18, 0.0  ;;  %v1219_v53 = vpack.c.bf16 %v1213_v50, %v1211_v17  ;;  %v1434_v50 = vpop.permute.xlu0 %1433 }
 0x650   :  { %v1218_v46 = vmax.f32 %v2549_v44, 0.0  ;;  %v1221_v52 = vpack.c.bf16 %v1217_v45, %v1215_v48 }
 0x652   :  { %v1222_v49 = vpack.c.bf16 %v1218_v46, %v1216_v2 }
 0x654   :  { %1281 = vmatprep.subr.bf16.mxu1 %v1222_v49  ;;  %v1439_v49 = vpop.permute.xlu1 %1438 }
 0x655   :  { %1282 = vmatpush1.bf16.msra.mxu1 %v1221_v52 }
 0x656   :  { %1283 = vmatprep.subr.bf16.mxu1 %v1220_v7 }
 0x659   :  { %1284 = vmatpush1.bf16.msra.mxu1 %v1219_v53 }
 0x65c   :  { %1921 = vmatmul.mubr.msk.bf16.vlgmr.msra.gmra.mxu1 %vm213_vm0, %v2056_v55 }
 0x65d   :  { %1311 = vmatprep.mubr.bf16.mxu1 %v2088_v27 }
 0x664   :  { %1922 = vmatmul.mubr.msk.bf16.gmra.mxu1 %vm213_vm0, %v2057_v20 }
 0x665   :  { %1387 = vmatprep.mubr.bf16.mxu1 %v2088_v27 }
 0x700   :  { %v406_v38 = vpop.f32.mrf.mxu0 }
 0x702   :  { %v408_v41 = vpop.f32.mrf.mxu0 }
 0x704   :  { %v410_v58 = vpop.f32.mrf.mxu0 }
 0x706   :  { %v412_v42 = vpop.f32.mrf.mxu0 }
 0x707   :  { %v442_v17 = vpack.c.bf16 %v412_v42, %v408_v41 }
 0x708   :  { %v416_v62 = vpop.f32.mrf.mxu0 }
 0x70a   :  { %v418_v2 = vpop.f32.mrf.mxu0 }
 0x70c   :  { %v420_v48 = vpop.f32.mrf.mxu0 }
 0x70d   :  { %v443_v55 = vpack.c.bf16 %v420_v48, %v416_v62 }
 0x70e   :  { %v422_v52 = vpop.f32.mrf.mxu0 }
 0x71c   :  { %v1303_v23 = vpop.f32.mrf.mxu1 }
 0x71d   :  { %v1304_v31 = vadd.f32 %v1303_v23, %v1236_v10  ;;  %v444_v23 = vpack.c.bf16 %v422_v52, %v418_v2  ;;  %v2063_v2 = vld [vmem:[%s2658_s2 + $0x48] sm:$0xff]  }
 0x71e   :  { %v1305_v59 = vpop.f32.mrf.mxu1 }
 0x71f   :  { %v1306_v24 = vadd.f32 %v1305_v59, %v1236_v10  ;;  %v1322_v16 = vmax.f32 %v1304_v31, 0.0 }
 0x720   :  { %v1307_v60 = vpop.f32.mrf.mxu1 }
 0x721   :  { %v1308_v26 = vadd.f32 %v1307_v60, %v1241_v21  ;;  %v1323_v32 = vmax.f32 %v1306_v24, 0.0  ;;  %v1429_v60 = vpop.permute.xlu1 %1428  ;;  %v1450_v24 = vunpack.c.l.bf16 %v442_v17 }
 0x722   :  { %v1309_v13 = vpop.f32.mrf.mxu1 }
 0x723   :  { %v1310_v5 = vadd.f32 %v1309_v13, %v1241_v21  ;;  %v1324_v14 = vmax.f32 %v1308_v26, 0.0 }
 0x724   :  { %v1313_v63 = vpop.f32.mrf.mxu1 }
 0x725   :  { %v1314_v11 = vadd.f32 %v1313_v63, %v1246_v22  ;;  %v1325_v29 = vmax.f32 %v1310_v5, 0.0  ;;  %v1330_v36 = vpack.c.bf16 %v1324_v14, %v1322_v16  ;;  %v1452_v63 = vunpack.c.h.bf16 %v442_v17 }
 0x726   :  { %v1315_v0 = vpop.f32.mrf.mxu1 }
 0x727   :  { %v1316_v6 = vadd.f32 %v1315_v0, %v1246_v22  ;;  %v1326_v9 = vmax.f32 %v1314_v11, 0.0  ;;  %v1331_v35 = vpack.c.bf16 %v1325_v29, %v1323_v32  ;;  %v1454_v11 = vunpack.c.l.bf16 %v444_v23 }
 0x728   :  { %v1317_v4 = vpop.f32.mrf.mxu1 }
 0x729   :  { %v1318_v8 = vadd.f32 %v1317_v4, %v1251_v61  ;;  %v1327_v30 = vmax.f32 %v1316_v6, 0.0  ;;  %v1455_v6 = vunpack.c.h.bf16 %v443_v55 }
 0x72a   :  { %v1319_v15 = vpop.f32.mrf.mxu1 }
 0x72b   :  { %v1320_v25 = vadd.f32 %v1319_v15, %v1251_v61  ;;  %v1328_v28 = vmax.f32 %v1318_v8, 0.0  ;;  %v441_v61 = vpack.c.bf16 %v410_v58, %v406_v38 }
 0x72d   :  { %v1329_v51 = vmax.f32 %v1320_v25, 0.0  ;;  %v1332_v34 = vpack.c.bf16 %v1328_v28, %v1326_v9  ;;  %v1456_v25 = vunpack.c.h.bf16 %v444_v23 }
 0x72f   :  { %v1333_v33 = vpack.c.bf16 %v1329_v51, %v1327_v30  ;;  %v1451_v30 = vunpack.c.h.bf16 %v441_v61 }
 0x731   :  { %1367 = vmatprep.subr.bf16.mxu1 %v1333_v33 }
 0x732   :  { %1368 = vmatpush1.bf16.msra.mxu1 %v1332_v34 }
 0x733   :  { %1369 = vmatprep.subr.bf16.mxu1 %v1331_v35 }
 0x736   :  { %1370 = vmatpush1.bf16.msra.mxu1 %v1330_v36 }
 0x739   :  { %1929 = vmatmul.mubr.msk.bf16.vlgmr.msra.gmra.mxu1 %vm213_vm0, %v2059_v37 }
 0x73a   :  { %1397 = vmatprep.mubr.bf16.mxu1 %v2088_v27 }
 0x741   :  { %1930 = vmatmul.mubr.msk.bf16.gmra.mxu1 %vm213_vm0, %v2061_v3 }
 0x742   :  { %1555 = vmatprep.mubr.bf16.mxu1 %v2088_v27 }
 0x7f9   :  { %v1389_v45 = vpop.f32.mrf.mxu1 }
 0x7fa   :  { %v1408_v5 = vadd.f32 %v1389_v45, %v2557_v12  ;;  %v1449_v12 = vunpack.c.l.bf16 %v441_v61  ;;  %v2062_v45 = vld [vmem:[%s2658_s2 + $0x40] sm:$0xff]  }
 0x7fb   :  { %v1391_v46 = vpop.f32.mrf.mxu1 }
 0x7fc   :  { %v1409_v57 = vadd.f32 %v1391_v46, %v2547_v1 }
 0x7fd   :  { %v1393_v47 = vpop.f32.mrf.mxu1 }
 0x7fe   :  { %v1410_v13 = vadd.f32 %v1393_v47, %v2551_v54 }
 0x7ff   :  { %v1395_v19 = vpop.f32.mrf.mxu1 }
 0x800   :  { %v1411_v53 = vadd.f32 %v1395_v19, %v2539_v39  ;;  %v1424_v39 = vpop.permute.xlu0 %1423  ;;  %v1443_v54 = vadd.f32 %v1429_v60, %v1410_v13 }
 0x801   :  { %v1399_v7 = vpop.f32.mrf.mxu1  ;;  %v1442_v10 = vadd.f32 %v1424_v39, %v1409_v57  ;;  %v1441_v51 = vadd.f32 %v1424_v39, %v1408_v5 }
 0x802   :  { %v1412_v20 = vadd.f32 %v1399_v7, %v2545_v43  ;;  %v1444_v0 = vadd.f32 %v1429_v60, %v1411_v53  ;;  %v1453_v43 = vunpack.c.l.bf16 %v443_v55 }
 0x803   :  { %v1401_v56 = vpop.f32.mrf.mxu1  ;;  %v2610_v9 = vadd.f32 %v1450_v24, %v1442_v10  ;;  %v1457_v16 = vadd.f32 %v1449_v12, %v1441_v51 }
 0x804   :  { %v1413_v59 = vadd.f32 %v1401_v56, %v2541_v40  ;;  %v1445_v8 = vadd.f32 %v1434_v50, %v1412_v20  ;;  %v2602_v26 = vadd.f32 %v1452_v63, %v1444_v0 }
 0x805   :  { %v1403_v22 = vpop.f32.mrf.mxu1  ;;  %v1466_v3 = vmax.f32 %v2610_v9, 0.0  ;;  %v1465_v42 = vmax.f32 %v1457_v16, 0.0 }
 0x806   :  { %v1446_v21 = vadd.f32 %v1434_v50, %v1413_v59  ;;  %v1414_v4 = vadd.f32 %v1403_v22, %v2543_v18  ;;  %v2608_v31 = vadd.f32 %v1453_v43, %v1445_v8  ;;  %v1468_v35 = vmax.f32 %v2602_v26, 0.0  ;;  %v1500_v50 = vpop.permute.xlu0 %1499 }
 0x807   :  { %v1405_v1 = vpop.f32.mrf.mxu1 }
 0x808   :  { %v1447_v40 = vadd.f32 %v1439_v49, %v1414_v4  ;;  %v1415_v15 = vadd.f32 %v1405_v1, %v2549_v44  ;;  %v2604_v28 = vadd.f32 %v1454_v11, %v1446_v21  ;;  %v2614_v44 = vadd.f32 %v1451_v30, %v1443_v54 }
 0x809   :  { %v1469_v36 = vmax.f32 %v2608_v31, 0.0  ;;  %v1474_v58 = vpack.c.bf16 %v1468_v35, %v1466_v3 }
 0x80a   :  { %v2606_v18 = vadd.f32 %v1455_v6, %v1447_v40  ;;  %v1448_v29 = vadd.f32 %v1439_v49, %v1415_v15  ;;  %v1470_v14 = vmax.f32 %v2604_v28, 0.0  ;;  %v1467_v38 = vmax.f32 %v2614_v44, 0.0  ;;  %v1505_v49 = vpop.permute.xlu1 %1504  ;;  %v1490_v57 = vpop.permute.xlu0 %1489  ;;  %v2064_v40 = vld [vmem:[%s2660_s4 + $0x40] sm:$0xff]   ;;  %v2065_v15 = vld [vmem:[%s2660_s4 + $0x48] sm:$0xff]  }
 0x80c   :  { %v2612_v32 = vadd.f32 %v1456_v25, %v1448_v29  ;;  %v1471_v33 = vmax.f32 %v2606_v18, 0.0  ;;  %v1473_v62 = vpack.c.bf16 %v1467_v38, %v1465_v42 }
 0x80e   :  { %v1472_v34 = vmax.f32 %v2612_v32, 0.0  ;;  %v1475_v41 = vpack.c.bf16 %v1471_v33, %v1469_v36  ;;  %v1495_v17 = vpop.permute.xlu1 %1494  ;;  %v1688_v24 = vpop.permute.xlu0 %1687 }
 0x810   :  { %v1476_v37 = vpack.c.bf16 %v1472_v34, %v1470_v14 }
 0x812   :  { %1535 = vmatprep.subr.bf16.mxu1 %v1476_v37  ;;  %v1693_v29 = vpop.permute.xlu1 %1692  ;;  %v1678_v51 = vpop.permute.xlu0 %1677 }
 0x813   :  { %1536 = vmatpush1.bf16.msra.mxu1 %v1475_v41 }
 0x814   :  { %1537 = vmatprep.subr.bf16.mxu1 %v1474_v58 }
 0x816   :  { %v1683_v3 = vpop.permute.xlu1 %1682 }
 0x817   :  { %1538 = vmatpush1.bf16.msra.mxu1 %v1473_v62 }
 0x81a   :  { %1945 = vmatmul.mubr.msk.bf16.vlgmr.msra.gmra.mxu1 %vm213_vm0, %v2062_v45 }
 0x81b   :  { %1565 = vmatprep.mubr.bf16.mxu1 %v2088_v27 }
 0x822   :  { %1946 = vmatmul.mubr.msk.bf16.gmra.mxu1 %vm213_vm0, %v2063_v2 }
 0x823   :  { %1757 = vmatprep.mubr.bf16.mxu1 %v2088_v27 }
 0x8da   :  { %v1557_v46 = vpop.f32.mrf.mxu1 }
 0x8db   :  { %v1558_v4 = vadd.f32 %v1557_v46, %v1490_v57 }
 0x8dc   :  { %v1559_v47 = vpop.f32.mrf.mxu1 }
 0x8dd   :  { %v1560_v60 = vadd.f32 %v1559_v47, %v1490_v57  ;;  %v1576_v10 = vmax.f32 %v1558_v4, 0.0 }
 0x8de   :  { %v1561_v48 = vpop.f32.mrf.mxu1 }
 0x8df   :  { %v1562_v13 = vadd.f32 %v1561_v48, %v1495_v17  ;;  %v1577_v5 = vmax.f32 %v1560_v60, 0.0  ;;  %v1720_v60 = vpop.permute.xlu0 %1719 }
 0x8e0   :  { %v1563_v19 = vpop.f32.mrf.mxu1 }
 0x8e1   :  { %v1564_v55 = vadd.f32 %v1563_v19, %v1495_v17  ;;  %v1578_v6 = vmax.f32 %v1562_v13, 0.0 }
 0x8e2   :  { %v1567_v52 = vpop.f32.mrf.mxu1 }
 0x8e3   :  { %v1568_v23 = vadd.f32 %v1567_v52, %v1500_v50  ;;  %v1579_v63 = vmax.f32 %v1564_v55, 0.0  ;;  %v1584_v11 = vpack.c.bf16 %v1578_v6, %v1576_v10 }
 0x8e4   :  { %v1569_v7 = vpop.f32.mrf.mxu1 }
 0x8e5   :  { %v1570_v20 = vadd.f32 %v1569_v7, %v1500_v50  ;;  %v1580_v39 = vmax.f32 %v1568_v23, 0.0  ;;  %v1585_v1 = vpack.c.bf16 %v1579_v63, %v1577_v5  ;;  %v1715_v23 = vld [vmem:[%s2662_s6] sm:$0xf] }
 0x8e6   :  { %v1571_v53 = vpop.f32.mrf.mxu1 }
 0x8e7   :  { %v1572_v56 = vadd.f32 %v1571_v53, %v1505_v49  ;;  %v1581_v0 = vmax.f32 %v1570_v20, 0.0 }
 0x8e8   :  { %v1573_v59 = vpop.f32.mrf.mxu1 }
 0x8e9   :  { %v1574_v61 = vadd.f32 %v1573_v59, %v1505_v49  ;;  %v1582_v22 = vmax.f32 %v1572_v56, 0.0 }
 0x8eb   :  { %v1583_v21 = vmax.f32 %v1574_v61, 0.0  ;;  %v1586_v8 = vpack.c.bf16 %v1582_v22, %v1580_v39 }
 0x8ed   :  { %v1587_v43 = vpack.c.bf16 %v1583_v21, %v1581_v0 }
 0x8ef   :  { %1621 = vmatprep.subr.bf16.mxu0 %v1587_v43 }
 0x8f0   :  { %1622 = vmatpush1.bf16.msra.mxu0 %v1586_v8 }
 0x8f1   :  { %1623 = vmatprep.subr.bf16.mxu0 %v1585_v1 }
 0x8f4   :  { %1624 = vmatpush1.bf16.msra.mxu0 %v1584_v11 }
 0x8f7   :  { %1953 = vmatmul.mubr.msk.bf16.vlgmr.msra.gmra.mxu0 %vm213_vm0, %v2064_v40 }
 0x8f8   :  { %1651 = vmatprep.mubr.bf16.mxu0 %v2088_v27 }
 0x8ff   :  { %1954 = vmatmul.mubr.msk.bf16.gmra.mxu0 %vm213_vm0, %v2065_v15 }
 0x9b7   :  { %v1643_v54 = vpop.f32.mrf.mxu0 }
 0x9b8   :  { %v1662_v25 = vadd.f32 %v1643_v54, %v1457_v16 }
 0x9b9   :  { %v1645_v12 = vpop.f32.mrf.mxu0 }
 0x9ba   :  { %v1663_v30 = vadd.f32 %v1645_v12, %v2610_v9  ;;  %v1695_v14 = vadd.f32 %v1678_v51, %v1662_v25 }
 0x9bb   :  { %v1647_v33 = vpop.f32.mrf.mxu0 }
 0x9bc   :  { %v1696_v34 = vadd.f32 %v1678_v51, %v1663_v30  ;;  %v1664_v35 = vadd.f32 %v1647_v33, %v2614_v44  ;;  %v1703_v57 = vmax.f32 %v1695_v14, 0.0 }
 0x9bd   :  { %v1649_v27 = vpop.f32.mrf.mxu0 }
 0x9be   :  { %v1965_v36 = vpack.c.bf16 %v1696_v34, %v1695_v14  ;;  %v1665_v37 = vadd.f32 %v1649_v27, %v2602_v26  ;;  %v1697_v41 = vadd.f32 %v1683_v3, %v1664_v35 }
 0x9bf   :  { %v1653_v38 = vpop.f32.mrf.mxu0 }
 0x9c0   :  { %1798 = vst [vmem:[#allocation2] sm:$0xff] %v1965_v36  ;;  %v1698_v58 = vadd.f32 %v1683_v3, %v1665_v37  ;;  %v1666_v16 = vadd.f32 %v1653_v38, %v2608_v31  ;;  %v1705_v20 = vmax.f32 %v1697_v41, 0.0 }
 0x9c1   :  { %v1655_v42 = vpop.f32.mrf.mxu0 }
 0x9c2   :  { %v1966_v62 = vpack.c.bf16 %v1698_v58, %v1697_v41  ;;  %v1667_v9 = vadd.f32 %v1655_v42, %v2604_v28  ;;  %v1699_v44 = vadd.f32 %v1688_v24, %v1666_v16  ;;  %v1706_v52 = vmax.f32 %v1698_v58, 0.0 }
 0x9c3   :  { %v1657_v45 = vpop.f32.mrf.mxu0  ;;  %v1704_v28 = vmax.f32 %v1696_v34, 0.0 }
 0x9c4   :  { %1799 = vst [vmem:[#allocation2 + $0x8] sm:$0xff] %v1966_v62  ;;  %v1668_v2 = vadd.f32 %v1657_v45, %v2606_v18  ;;  %v1700_v46 = vadd.f32 %v1688_v24, %v1667_v9  ;;  %v1707_v53 = vmax.f32 %v1699_v44, 0.0 }
 0x9c5   :  { %v1659_v47 = vpop.f32.mrf.mxu0  ;;  %v1712_v56 = vpack.c.bf16 %v1706_v52, %v1704_v28 }
 0x9c6   :  { %v1701_v48 = vadd.f32 %v1693_v29, %v1668_v2  ;;  %v1669_v26 = vadd.f32 %v1659_v47, %v2612_v32  ;;  %v1967_v49 = vpack.c.bf16 %v1700_v46, %v1699_v44  ;;  %v1708_v31 = vmax.f32 %v1700_v46, 0.0 }
 0x9c7   :  { %v1711_v32 = vpack.c.bf16 %v1705_v20, %v1703_v57 }
 0x9c8   :  { %v1702_v19 = vadd.f32 %v1693_v29, %v1669_v26  ;;  %1800 = vst [vmem:[#allocation2 + $0x10] sm:$0xff] %v1967_v49  ;;  %v1709_v50 = vmax.f32 %v1701_v48, 0.0 }
 0x9ca   :  { %v1710_v7 = vmax.f32 %v1702_v19, 0.0  ;;  %v1968_v17 = vpack.c.bf16 %v1702_v19, %v1701_v48  ;;  %v1713_v18 = vpack.c.bf16 %v1709_v50, %v1707_v53 }
 0x9cc   :  { %1801 = vst [vmem:[#allocation2 + $0x18] sm:$0xff] %v1968_v17  ;;  %v1714_v55 = vpack.c.bf16 %v1710_v7, %v1708_v31 }
 0x9ce   :  { %1737 = vmatprep.subr.bf16.mxu1 %v1714_v55 }
 0x9cf   :  { %1738 = vmatpush1.bf16.msra.mxu1 %v1713_v18 }
 0x9d0   :  { %1739 = vmatprep.subr.bf16.mxu1 %v1712_v56 }
 0x9d3   :  { %1740 = vmatpush1.bf16.msra.mxu1 %v1711_v32 }
 0x9d6   :  { %1959 = vmatmul.mubr.msk.bf16.vlgmr.msra.gmra.mxu1 %vm213_vm0, %v1715_v23 }
 0xa96   :  { %v1759_v59 = vpop.f32.mrf.mxu1 }
 0xa97   :  { %v1760_v13 = vadd.f32 %v1759_v59, %v1720_v60 }
 0xa98   :  { %v1761_v61 = vpop.f32.mrf.mxu1 }
 0xa99   :  { %v1762_v22 = vadd.f32 %v1761_v61, %v1720_v60 }
 0xa9a   :  { %v1763_v63 = vpop.f32.mrf.mxu1 }
 0xa9b   :  { %v1969_v0 = vpack.c.bf16 %v1762_v22, %v1760_v13 }
 0xa9c   :  { %v1764_v21 = vpop.f32.mrf.mxu1 }
 0xa9d   :  { %1802 = vst [vmem:[#allocation2 + $0x20] sm:$0xff] %v1969_v0 }
 0xa9e   :  { %2077 = shalt.err (!%p2074_p4)
}
 0xa9f   :  { %s2090_s6 = smov 128   ;;  %s2091_s12 = smov 8  }
 0xaa0   :  { %1814 = dma.vmem_to_hbm [thread:$0]  %s1809_s10, 640, %s2664_s8, [#allocation3], %s2090_s6, %s2090_s6, %s2091_s12  }
 0xaa1   :  { %2086 = dma.done.wait [#allocation3], 640  }
 0xaa2   :  { %2087 = vsyncadd [#allocation3], 4294966656 }
 0xaa3   :  { %1818 = vsyncpa [#allocation3], 1 }

</bundles_post_ra>
